<compile_context>
chip_gen: v6e
topology: v6e:2x2x1
jax: 0.10.0
libtpu: 0.0.40
codegen_flags: <defaults>
</compile_context>

<pallas_src>
import functools

import numpy as np

import jax
import jax.numpy as jnp
from jax.experimental import pallas as pl
from jax.experimental.pallas import tpu as pltpu

LEAK = 0.2
BN_EPS = 1e-5
VMEM_LIMIT_BYTES = 32 * 1024 * 1024


def _leaky(x):
    # LeakyReLU(0.2): max(x, 0.2*x)
    return jnp.maximum(x, LEAK * x)


# ----------------------------------------------------------------------------
# Kernel A: FeatureExtractor (3x conv1d(k=3, pad=1) + BN/LeakyReLU), rows = N*L
# ----------------------------------------------------------------------------
def _feature_kernel(x_ref, pmask_ref, nmask_ref,
                    w1m_ref, w1z_ref, w1p_ref, cb1_ref,
                    w2m_ref, w2z_ref, w2p_ref, cb2_ref, g2_ref, be2_ref,
                    w3m_ref, w3z_ref, w3p_ref, cb3_ref, g3_ref, be3_ref,
                    h3_ref):
    f32 = jnp.float32
    bf16 = jnp.bfloat16

    pmask = pmask_ref[...]          # (R, 1) bf16 0/1: zero where row is first of a sample
    nmask = nmask_ref[...]          # (R, 1) bf16 0/1: zero where row is last of a sample

    def conv(h, wm_ref, wz_ref, wp_ref, b_ref):
        # conv1d(k=3, pad=1) as three accumulated (Cin,Cout) tap matmuls; neighbour rows
        # via a ±1 row roll (sublane shift) + boundary mask, no (R,R) matmul, no lane concat.
        hb = h.astype(bf16)
        prev = jnp.roll(hb, 1, axis=0) * pmask
        nxt = jnp.roll(hb, -1, axis=0) * nmask
        out = jnp.dot(prev, wm_ref[...], preferred_element_type=f32)
        out = out + jnp.dot(hb, wz_ref[...], preferred_element_type=f32)
        out = out + jnp.dot(nxt, wp_ref[...], preferred_element_type=f32)
        return out + b_ref[...]

    def batchnorm(h, g_ref, be_ref):
        # training-mode BN: batch stats over N and L (all rows), biased variance, eps=1e-5.
        inv_n = 1.0 / h.shape[0]
        mean = jnp.sum(h, axis=0, keepdims=True) * inv_n
        var = jnp.sum(h * h, axis=0, keepdims=True) * inv_n - mean * mean
        var = jnp.maximum(var, 0.0)                      # guard one-pass cancellation
        scale = g_ref[...] * jax.lax.rsqrt(var + BN_EPS)  # (1, C)
        shift = be_ref[...] - mean * scale                # (1, C)
        return h * scale + shift

    x = x_ref[...]                                               # (R, C0) f32, channels-last
    h = _leaky(conv(x, w1m_ref, w1z_ref, w1p_ref, cb1_ref))
    h = _leaky(batchnorm(conv(h, w2m_ref, w2z_ref, w2p_ref, cb2_ref), g2_ref, be2_ref))
    h3_ref[...] = batchnorm(conv(h, w3m_ref, w3z_ref, w3p_ref, cb3_ref), g3_ref, be3_ref)


# ----------------------------------------------------------------------------
# Kernel B: 4-layer MLP + hard gumbel-softmax (tau=1) epilogue
# ----------------------------------------------------------------------------
def _mlp_gumbel_kernel(K, L,
                       feat_ref, noise_ref, gumbel_ref,
                       w1f_ref, w1n_ref, b1_ref,
                       w2_ref, b2_ref,
                       w3_ref, b3_ref,
                       w4_ref, b4_ref,
                       onehot_ref):
    f32 = jnp.float32
    bf16 = jnp.bfloat16

    # First Linear split into feat / noise parts -> no in-kernel concat.
    h1 = _leaky(jnp.dot(feat_ref[...].astype(bf16), w1f_ref[...], preferred_element_type=f32)
                + jnp.dot(noise_ref[...].astype(bf16), w1n_ref[...], preferred_element_type=f32)
                + b1_ref[...])
    h2 = _leaky(jnp.dot(h1.astype(bf16), w2_ref[...], preferred_element_type=f32) + b2_ref[...])
    hm = _leaky(jnp.dot(h2.astype(bf16), w3_ref[...], preferred_element_type=f32) + b3_ref[...])

    # Final Linear: ONE lane-dense matmul of width K*L (k-major column order k*L + l);
    # gumbel noise (same layout) added in-kernel; tau = 1.
    z = (jnp.dot(hm.astype(bf16), w4_ref[...], preferred_element_type=f32)
         + b4_ref[...] + gumbel_ref[...])                         # (N, K*L) f32

    # Hard gumbel-softmax: per-(n, l) argmax over K classes, first max wins.
    zs = [z[:, k * L:(k + 1) * L] for k in range(K)]              # K x (N, L) lane slices
    zmax = zs[0]
    for k in range(1, K):
        zmax = jnp.maximum(zmax, zs[k])
    taken = jnp.zeros_like(zmax)
    outs = []
    for k in range(K):
        hit = jnp.logical_and(zs[k] >= zmax, taken < 0.5).astype(f32)
        outs.append(hit)
        taken = taken + hit
    # single lane-dense bf16 store, columns ordered k*L + l
    onehot_ref[...] = jnp.concatenate(outs, axis=-1).astype(onehot_ref.dtype)


# ----------------------------------------------------------------------------
# Wrapper
# ----------------------------------------------------------------------------
@functools.partial(jax.jit, static_argnames=("output_len", "num_classes"))
def generator_forward(noise, cond_data, params, gumbel_key, *, output_len, num_classes):
    N, L, C0 = cond_data.shape
    assert L == output_len
    K = num_classes
    R = N * L
    ext, mlp = params["ext"], params["mlp"]
    C3 = ext["w3z"].shape[-1]

    # Tiny (R,1) boundary masks, built from static shapes (constant-folded under jit), bf16.
    r = np.arange(R)
    pmask = jnp.asarray((r % L != 0).astype(np.float32)[:, None], jnp.bfloat16)
    nmask = jnp.asarray((r % L != L - 1).astype(np.float32)[:, None], jnp.bfloat16)

    x2d = cond_data.reshape(R, C0)          # free reshape: channels-last rows
    noise2d = noise.reshape(N, -1)

    vm = pl.BlockSpec(memory_space=pltpu.MemorySpace.VMEM)
    cparams = pltpu.CompilerParams(vmem_limit_bytes=VMEM_LIMIT_BYTES)

    # --- Kernel A: feature extractor ---
    h3 = pl.pallas_call(
        _feature_kernel,
        out_shape=jax.ShapeDtypeStruct((R, C3), jnp.float32),
        in_specs=[vm] * 19,
        out_specs=vm,
        compiler_params=cparams,
    )(x2d, pmask, nmask,
      ext["w1m"], ext["w1z"], ext["w1p"], ext["cb1"],
      ext["w2m"], ext["w2z"], ext["w2p"], ext["cb2"], ext["g2"], ext["be2"],
      ext["w3m"], ext["w3z"], ext["w3p"], ext["cb3"], ext["g3"], ext["be3"])

    # Layout plumbing on the host side where it is (nearly) free:
    #   natural row-major flatten for the MLP (zero-copy reshape),
    #   one small transpose for the PyTorch-ordered feat output (c*L + l).
    feat_nat = h3.reshape(N, L * C3)
    feat = h3.reshape(N, L, C3).transpose(0, 2, 1).reshape(N, C3 * L)

    # Gumbel(0,1) noise drawn outside the kernel (in-kernel TPU PRNG has no interpret/CPU path),
    # laid out k-major to match the fused final-Linear columns.
    gumbel = jax.random.gumbel(gumbel_key, (N, K * L), jnp.float32)

    # --- Kernel B: MLP + hard gumbel-softmax ---
    kernel_b = functools.partial(_mlp_gumbel_kernel, K, L)
    onehot = pl.pallas_call(
        kernel_b,
        out_shape=jax.ShapeDtypeStruct((N, K * L), jnp.bfloat16),
        in_specs=[vm] * 12,
        out_specs=vm,
        compiler_params=cparams,
    )(feat_nat, noise2d, gumbel,
      mlp["w1f"], mlp["w1n"], mlp["b1"],
      mlp["w2"], mlp["b2"],
      mlp["w3"], mlp["b3"],
      mlp["w4"], mlp["b4"])

    # onehot columns are k*L + l; reorder to the module's (N, L, K) output (0/1 exact in bf16).
    gen_output = onehot.astype(jnp.float32).reshape(N, K, L).transpose(0, 2, 1)
    return gen_output, feat


# ----------------------------------------------------------------------------
# Parameter init (deterministic, synthetic) -- weights stored kernel-ready:
#   conv weights split into three (Cin, Cout) tap blocks (torch (Cout, Cin, 3) taps, transposed),
#   Linear weights as (in, out); w1 split feat/noise with feat rows permuted to the natural
#   (l*C3 + c) flatten order; w4/b4 columns permuted to k-major (k*L + l) order.
# ----------------------------------------------------------------------------
def init_params(key, output_len, in_channels, num_classes, noise_feature_num,
                compressed_channels):
    c0, c1, c2 = in_channels, in_channels // 4, in_channels // 16
    c3 = compressed_channels
    L, K = output_len, num_classes
    ofn = L * K
    d_feat = c3 * L
    dims = [16 * ofn, 8 * ofn, 2 * ofn, ofn]
    keys = jax.random.split(key, 16)

    def w(k, shape, dtype=jnp.bfloat16, scale=0.05):
        return (scale * jax.random.normal(k, shape, jnp.float32)).astype(dtype)

    def conv_taps(k, cin, cout):
        # torch Conv1d weight (cout, cin, 3) -> taps (-1, 0, +1) each as (cin, cout) bf16
        wt = 0.05 * jax.random.normal(k, (cout, cin, 3), jnp.float32)
        return (wt[:, :, 0].T.astype(jnp.bfloat16),
                wt[:, :, 1].T.astype(jnp.bfloat16),
                wt[:, :, 2].T.astype(jnp.bfloat16))

    w1m, w1z, w1p = conv_taps(keys[0], c0, c1)
    w2m, w2z, w2p = conv_taps(keys[2], c1, c2)
    w3m, w3z, w3p = conv_taps(keys[4], c2, c3)
    ext = dict(
        w1m=w1m, w1z=w1z, w1p=w1p, cb1=w(keys[1], (1, c1), jnp.float32),
        w2m=w2m, w2z=w2z, w2p=w2p, cb2=w(keys[3], (1, c2), jnp.float32),
        g2=jnp.ones((1, c2), jnp.float32), be2=jnp.zeros((1, c2), jnp.float32),
        w3m=w3m, w3z=w3z, w3p=w3p, cb3=w(keys[5], (1, c3), jnp.float32),
        g3=jnp.ones((1, c3), jnp.float32), be3=jnp.zeros((1, c3), jnp.float32),
    )

    # First Linear (in = d_feat + noise, out = 16*ofn), torch feature-row order is c*L + l.
    w1_full = 0.05 * jax.random.normal(keys[6], (d_feat + noise_feature_num, dims[0]),
                                       jnp.float32)
    nat = np.arange(d_feat)
    row_perm = (nat % c3) * L + nat // c3          # natural index l*c3+c -> torch index c*L+l
    w1f = w1_full[:d_feat][row_perm].astype(jnp.bfloat16)
    w1n = w1_full[d_feat:].astype(jnp.bfloat16)

    # Final Linear (in = 2*ofn, out = L*K), torch column order l*K + k -> k-major k*L + l.
    w4_full = 0.05 * jax.random.normal(keys[12], (dims[2], dims[3]), jnp.float32)
    b4_full = 0.05 * jax.random.normal(keys[13], (dims[3],), jnp.float32)
    t = np.arange(K * L)
    col_perm = (t % L) * K + t // L
    w4 = w4_full[:, col_perm].astype(jnp.bfloat16)
    b4 = b4_full[col_perm].reshape(1, K * L).astype(jnp.float32)

    mlp = dict(
        w1f=w1f, w1n=w1n, b1=w(keys[7], (1, dims[0]), jnp.float32),
        w2=w(keys[8], (dims[0], dims[1])), b2=w(keys[9], (1, dims[1]), jnp.float32),
        w3=w(keys[10], (dims[1], dims[2])), b3=w(keys[11], (1, dims[2]), jnp.float32),
        w4=w4, b4=b4,
    )
    return dict(ext=ext, mlp=mlp)


if __name__ == "__main__":
    # small-but-consistent config: in_channels must be divisible by 16
    N = 2
    output_len = 8
    in_channels = 32
    num_classes = 4
    noise_feature_num = 16
    compressed_channels = 16

    key = jax.random.PRNGKey(0)
    k_param, k_cond, k_noise, k_gumbel = jax.random.split(key, 4)

    params = init_params(k_param, output_len, in_channels, num_classes,
                         noise_feature_num, compressed_channels)
    cond_data = jax.random.normal(k_cond, (N, output_len, in_channels), jnp.float32)
    noise = jax.random.normal(k_noise, (N, noise_feature_num), jnp.float32)

    gen_output, cond_feat = generator_forward(
        noise, cond_data, params, k_gumbel,
        output_len=output_len, num_classes=num_classes)
    jax.block_until_ready((gen_output, cond_feat))

    assert gen_output.shape == (N, output_len, num_classes)
    assert cond_feat.shape == (N, compressed_channels * output_len)
    # hard gumbel-softmax: each row of the last axis is one-hot
    assert bool(jnp.all(jnp.sum(gen_output, axis=-1) == 1.0))
    print("KERNEL_OK")
</pallas_src>

<mosaic_0001>
module attributes {stable_mosaic.version = 11 : i64} {
  func.func @_feature_kernel(%arg0: memref<16x32xf32, #tpu.memory_space<vmem>>, %arg1: memref<16x1xbf16, #tpu.memory_space<vmem>>, %arg2: memref<16x1xbf16, #tpu.memory_space<vmem>>, %arg3: memref<32x8xbf16, #tpu.memory_space<vmem>>, %arg4: memref<32x8xbf16, #tpu.memory_space<vmem>>, %arg5: memref<32x8xbf16, #tpu.memory_space<vmem>>, %arg6: memref<1x8xf32, #tpu.memory_space<vmem>>, %arg7: memref<8x2xbf16, #tpu.memory_space<vmem>>, %arg8: memref<8x2xbf16, #tpu.memory_space<vmem>>, %arg9: memref<8x2xbf16, #tpu.memory_space<vmem>>, %arg10: memref<1x2xf32, #tpu.memory_space<vmem>>, %arg11: memref<1x2xf32, #tpu.memory_space<vmem>>, %arg12: memref<1x2xf32, #tpu.memory_space<vmem>>, %arg13: memref<2x16xbf16, #tpu.memory_space<vmem>>, %arg14: memref<2x16xbf16, #tpu.memory_space<vmem>>, %arg15: memref<2x16xbf16, #tpu.memory_space<vmem>>, %arg16: memref<1x16xf32, #tpu.memory_space<vmem>>, %arg17: memref<1x16xf32, #tpu.memory_space<vmem>>, %arg18: memref<1x16xf32, #tpu.memory_space<vmem>>, %arg19: memref<16x16xf32, #tpu.memory_space<vmem>>) attributes {dimension_semantics = [], scalar_prefetch = 0 : i64, scratch_operands = 0 : i64, tpu.core_type = #tpu.core_type<tc>} {
    %c0 = arith.constant 0 : index
    %c0_0 = arith.constant 0 : index
    %0 = vector.load %arg1[%c0, %c0_0] : memref<16x1xbf16, #tpu.memory_space<vmem>>, vector<16x1xbf16>
    %c0_1 = arith.constant 0 : index
    %c0_2 = arith.constant 0 : index
    %1 = vector.load %arg2[%c0_1, %c0_2] : memref<16x1xbf16, #tpu.memory_space<vmem>>, vector<16x1xbf16>
    %c0_3 = arith.constant 0 : index
    %c0_4 = arith.constant 0 : index
    %2 = vector.load %arg0[%c0_3, %c0_4] : memref<16x32xf32, #tpu.memory_space<vmem>>, vector<16x32xf32>
    %3 = arith.truncf %2 : vector<16x32xf32> to vector<16x32xbf16>
    %4 = vector.extract_strided_slice %3 {offsets = [15, 0], sizes = [1, 32], strides = [1, 1]} : vector<16x32xbf16> to vector<1x32xbf16>
    %5 = vector.extract_strided_slice %3 {offsets = [0, 0], sizes = [15, 32], strides = [1, 1]} : vector<16x32xbf16> to vector<15x32xbf16>
    %6 = tpu.concatenate %4, %5 in 0 : vector<1x32xbf16>, vector<15x32xbf16> -> vector<16x32xbf16>
    %7 = vector.broadcast %0 : vector<16x1xbf16> to vector<16x32xbf16>
    %8 = arith.mulf %6, %7 : vector<16x32xbf16>
    %9 = vector.extract_strided_slice %3 {offsets = [1, 0], sizes = [15, 32], strides = [1, 1]} : vector<16x32xbf16> to vector<15x32xbf16>
    %10 = vector.extract_strided_slice %3 {offsets = [0, 0], sizes = [1, 32], strides = [1, 1]} : vector<16x32xbf16> to vector<1x32xbf16>
    %11 = tpu.concatenate %9, %10 in 0 : vector<15x32xbf16>, vector<1x32xbf16> -> vector<16x32xbf16>
    %12 = vector.broadcast %1 : vector<16x1xbf16> to vector<16x32xbf16>
    %13 = arith.mulf %11, %12 : vector<16x32xbf16>
    %c0_5 = arith.constant 0 : index
    %c0_6 = arith.constant 0 : index
    %14 = vector.load %arg3[%c0_5, %c0_6] : memref<32x8xbf16, #tpu.memory_space<vmem>>, vector<32x8xbf16>
    %cst = arith.constant dense<0.000000e+00> : vector<16x8xf32>
    %15 = tpu.matmul %8, %14, %cst {dimension_numbers = #tpu.dot_dimension_numbers<[1], [0], [0], [1], [0, 0, 1, 1], [], []>} : vector<16x32xbf16>, vector<32x8xbf16>, vector<16x8xf32> -> vector<16x8xf32>
    %c0_7 = arith.constant 0 : index
    %c0_8 = arith.constant 0 : index
    %16 = vector.load %arg4[%c0_7, %c0_8] : memref<32x8xbf16, #tpu.memory_space<vmem>>, vector<32x8xbf16>
    %cst_9 = arith.constant dense<0.000000e+00> : vector<16x8xf32>
    %17 = tpu.matmul %3, %16, %cst_9 {dimension_numbers = #tpu.dot_dimension_numbers<[1], [0], [0], [1], [0, 0, 1, 1], [], []>} : vector<16x32xbf16>, vector<32x8xbf16>, vector<16x8xf32> -> vector<16x8xf32>
    %18 = arith.addf %15, %17 : vector<16x8xf32>
    %c0_10 = arith.constant 0 : index
    %c0_11 = arith.constant 0 : index
    %19 = vector.load %arg5[%c0_10, %c0_11] : memref<32x8xbf16, #tpu.memory_space<vmem>>, vector<32x8xbf16>
    %cst_12 = arith.constant dense<0.000000e+00> : vector<16x8xf32>
    %20 = tpu.matmul %13, %19, %cst_12 {dimension_numbers = #tpu.dot_dimension_numbers<[1], [0], [0], [1], [0, 0, 1, 1], [], []>} : vector<16x32xbf16>, vector<32x8xbf16>, vector<16x8xf32> -> vector<16x8xf32>
    %21 = arith.addf %18, %20 : vector<16x8xf32>
    %c0_13 = arith.constant 0 : index
    %c0_14 = arith.constant 0 : index
    %22 = vector.load %arg6[%c0_13, %c0_14] : memref<1x8xf32, #tpu.memory_space<vmem>>, vector<1x8xf32>
    %23 = vector.broadcast %22 : vector<1x8xf32> to vector<16x8xf32>
    %24 = arith.addf %21, %23 : vector<16x8xf32>
    %cst_15 = arith.constant 2.000000e-01 : f32
    %25 = vector.broadcast %cst_15 : f32 to vector<16x8xf32>
    %26 = arith.mulf %25, %24 : vector<16x8xf32>
    %27 = arith.maximumf %24, %26 : vector<16x8xf32>
    %28 = arith.truncf %27 : vector<16x8xf32> to vector<16x8xbf16>
    %29 = vector.extract_strided_slice %28 {offsets = [15, 0], sizes = [1, 8], strides = [1, 1]} : vector<16x8xbf16> to vector<1x8xbf16>
    %30 = vector.extract_strided_slice %28 {offsets = [0, 0], sizes = [15, 8], strides = [1, 1]} : vector<16x8xbf16> to vector<15x8xbf16>
    %31 = tpu.concatenate %29, %30 in 0 : vector<1x8xbf16>, vector<15x8xbf16> -> vector<16x8xbf16>
    %32 = vector.broadcast %0 : vector<16x1xbf16> to vector<16x8xbf16>
    %33 = arith.mulf %31, %32 : vector<16x8xbf16>
    %34 = vector.extract_strided_slice %28 {offsets = [1, 0], sizes = [15, 8], strides = [1, 1]} : vector<16x8xbf16> to vector<15x8xbf16>
    %35 = vector.extract_strided_slice %28 {offsets = [0, 0], sizes = [1, 8], strides = [1, 1]} : vector<16x8xbf16> to vector<1x8xbf16>
    %36 = tpu.concatenate %34, %35 in 0 : vector<15x8xbf16>, vector<1x8xbf16> -> vector<16x8xbf16>
    %37 = vector.broadcast %1 : vector<16x1xbf16> to vector<16x8xbf16>
    %38 = arith.mulf %36, %37 : vector<16x8xbf16>
    %c0_16 = arith.constant 0 : index
    %c0_17 = arith.constant 0 : index
    %39 = vector.load %arg7[%c0_16, %c0_17] : memref<8x2xbf16, #tpu.memory_space<vmem>>, vector<8x2xbf16>
    %cst_18 = arith.constant dense<0.000000e+00> : vector<16x2xf32>
    %40 = tpu.matmul %33, %39, %cst_18 {dimension_numbers = #tpu.dot_dimension_numbers<[1], [0], [0], [1], [0, 0, 1, 1], [], []>} : vector<16x8xbf16>, vector<8x2xbf16>, vector<16x2xf32> -> vector<16x2xf32>
    %c0_19 = arith.constant 0 : index
    %c0_20 = arith.constant 0 : index
    %41 = vector.load %arg8[%c0_19, %c0_20] : memref<8x2xbf16, #tpu.memory_space<vmem>>, vector<8x2xbf16>
    %cst_21 = arith.constant dense<0.000000e+00> : vector<16x2xf32>
    %42 = tpu.matmul %28, %41, %cst_21 {dimension_numbers = #tpu.dot_dimension_numbers<[1], [0], [0], [1], [0, 0, 1, 1], [], []>} : vector<16x8xbf16>, vector<8x2xbf16>, vector<16x2xf32> -> vector<16x2xf32>
    %43 = arith.addf %40, %42 : vector<16x2xf32>
    %c0_22 = arith.constant 0 : index
    %c0_23 = arith.constant 0 : index
    %44 = vector.load %arg9[%c0_22, %c0_23] : memref<8x2xbf16, #tpu.memory_space<vmem>>, vector<8x2xbf16>
    %cst_24 = arith.constant dense<0.000000e+00> : vector<16x2xf32>
    %45 = tpu.matmul %38, %44, %cst_24 {dimension_numbers = #tpu.dot_dimension_numbers<[1], [0], [0], [1], [0, 0, 1, 1], [], []>} : vector<16x8xbf16>, vector<8x2xbf16>, vector<16x2xf32> -> vector<16x2xf32>
    %46 = arith.addf %43, %45 : vector<16x2xf32>
    %c0_25 = arith.constant 0 : index
    %c0_26 = arith.constant 0 : index
    %47 = vector.load %arg10[%c0_25, %c0_26] : memref<1x2xf32, #tpu.memory_space<vmem>>, vector<1x2xf32>
    %48 = vector.broadcast %47 : vector<1x2xf32> to vector<16x2xf32>
    %49 = arith.addf %46, %48 : vector<16x2xf32>
    %cst_27 = arith.constant dense<0.000000e+00> : vector<2xf32>
    %50 = vector.multi_reduction <add>, %49, %cst_27 [0] : vector<16x2xf32> to vector<2xf32>
    %51 = vector.shape_cast %50 : vector<2xf32> to vector<1x2xf32>
    %cst_28 = arith.constant 6.250000e-02 : f32
    %52 = vector.broadcast %cst_28 : f32 to vector<1x2xf32>
    %53 = arith.mulf %51, %52 : vector<1x2xf32>
    %54 = arith.mulf %49, %49 : vector<16x2xf32>
    %cst_29 = arith.constant dense<0.000000e+00> : vector<2xf32>
    %55 = vector.multi_reduction <add>, %54, %cst_29 [0] : vector<16x2xf32> to vector<2xf32>
    %56 = vector.shape_cast %55 : vector<2xf32> to vector<1x2xf32>
    %cst_30 = arith.constant 6.250000e-02 : f32
    %57 = vector.broadcast %cst_30 : f32 to vector<1x2xf32>
    %58 = arith.mulf %56, %57 : vector<1x2xf32>
    %59 = arith.mulf %53, %53 : vector<1x2xf32>
    %60 = arith.subf %58, %59 : vector<1x2xf32>
    %cst_31 = arith.constant 0.000000e+00 : f32
    %61 = vector.broadcast %cst_31 : f32 to vector<1x2xf32>
    %62 = arith.maximumf %60, %61 : vector<1x2xf32>
    %c0_32 = arith.constant 0 : index
    %c0_33 = arith.constant 0 : index
    %63 = vector.load %arg11[%c0_32, %c0_33] : memref<1x2xf32, #tpu.memory_space<vmem>>, vector<1x2xf32>
    %cst_34 = arith.constant 9.99999974E-6 : f32
    %64 = vector.broadcast %cst_34 : f32 to vector<1x2xf32>
    %65 = arith.addf %62, %64 : vector<1x2xf32>
    %66 = math.rsqrt %65 : vector<1x2xf32>
    %67 = arith.mulf %63, %66 : vector<1x2xf32>
    %c0_35 = arith.constant 0 : index
    %c0_36 = arith.constant 0 : index
    %68 = vector.load %arg12[%c0_35, %c0_36] : memref<1x2xf32, #tpu.memory_space<vmem>>, vector<1x2xf32>
    %69 = arith.mulf %53, %67 : vector<1x2xf32>
    %70 = arith.subf %68, %69 : vector<1x2xf32>
    %71 = vector.broadcast %67 : vector<1x2xf32> to vector<16x2xf32>
    %72 = arith.mulf %49, %71 : vector<16x2xf32>
    %73 = vector.broadcast %70 : vector<1x2xf32> to vector<16x2xf32>
    %74 = arith.addf %72, %73 : vector<16x2xf32>
    %cst_37 = arith.constant 2.000000e-01 : f32
    %75 = vector.broadcast %cst_37 : f32 to vector<16x2xf32>
    %76 = arith.mulf %75, %74 : vector<16x2xf32>
    %77 = arith.maximumf %74, %76 : vector<16x2xf32>
    %78 = arith.truncf %77 : vector<16x2xf32> to vector<16x2xbf16>
    %79 = vector.extract_strided_slice %78 {offsets = [15, 0], sizes = [1, 2], strides = [1, 1]} : vector<16x2xbf16> to vector<1x2xbf16>
    %80 = vector.extract_strided_slice %78 {offsets = [0, 0], sizes = [15, 2], strides = [1, 1]} : vector<16x2xbf16> to vector<15x2xbf16>
    %81 = tpu.concatenate %79, %80 in 0 : vector<1x2xbf16>, vector<15x2xbf16> -> vector<16x2xbf16>
    %82 = vector.broadcast %0 : vector<16x1xbf16> to vector<16x2xbf16>
    %83 = arith.mulf %81, %82 : vector<16x2xbf16>
    %84 = vector.extract_strided_slice %78 {offsets = [1, 0], sizes = [15, 2], strides = [1, 1]} : vector<16x2xbf16> to vector<15x2xbf16>
    %85 = vector.extract_strided_slice %78 {offsets = [0, 0], sizes = [1, 2], strides = [1, 1]} : vector<16x2xbf16> to vector<1x2xbf16>
    %86 = tpu.concatenate %84, %85 in 0 : vector<15x2xbf16>, vector<1x2xbf16> -> vector<16x2xbf16>
    %87 = vector.broadcast %1 : vector<16x1xbf16> to vector<16x2xbf16>
    %88 = arith.mulf %86, %87 : vector<16x2xbf16>
    %c0_38 = arith.constant 0 : index
    %c0_39 = arith.constant 0 : index
    %89 = vector.load %arg13[%c0_38, %c0_39] : memref<2x16xbf16, #tpu.memory_space<vmem>>, vector<2x16xbf16>
    %cst_40 = arith.constant dense<0.000000e+00> : vector<16x16xf32>
    %90 = tpu.matmul %83, %89, %cst_40 {dimension_numbers = #tpu.dot_dimension_numbers<[1], [0], [0], [1], [0, 0, 1, 1], [], []>} : vector<16x2xbf16>, vector<2x16xbf16>, vector<16x16xf32> -> vector<16x16xf32>
    %c0_41 = arith.constant 0 : index
    %c0_42 = arith.constant 0 : index
    %91 = vector.load %arg14[%c0_41, %c0_42] : memref<2x16xbf16, #tpu.memory_space<vmem>>, vector<2x16xbf16>
    %cst_43 = arith.constant dense<0.000000e+00> : vector<16x16xf32>
    %92 = tpu.matmul %78, %91, %cst_43 {dimension_numbers = #tpu.dot_dimension_numbers<[1], [0], [0], [1], [0, 0, 1, 1], [], []>} : vector<16x2xbf16>, vector<2x16xbf16>, vector<16x16xf32> -> vector<16x16xf32>
    %93 = arith.addf %90, %92 : vector<16x16xf32>
    %c0_44 = arith.constant 0 : index
    %c0_45 = arith.constant 0 : index
    %94 = vector.load %arg15[%c0_44, %c0_45] : memref<2x16xbf16, #tpu.memory_space<vmem>>, vector<2x16xbf16>
    %cst_46 = arith.constant dense<0.000000e+00> : vector<16x16xf32>
    %95 = tpu.matmul %88, %94, %cst_46 {dimension_numbers = #tpu.dot_dimension_numbers<[1], [0], [0], [1], [0, 0, 1, 1], [], []>} : vector<16x2xbf16>, vector<2x16xbf16>, vector<16x16xf32> -> vector<16x16xf32>
    %96 = arith.addf %93, %95 : vector<16x16xf32>
    %c0_47 = arith.constant 0 : index
    %c0_48 = arith.constant 0 : index
    %97 = vector.load %arg16[%c0_47, %c0_48] : memref<1x16xf32, #tpu.memory_space<vmem>>, vector<1x16xf32>
    %98 = vector.broadcast %97 : vector<1x16xf32> to vector<16x16xf32>
    %99 = arith.addf %96, %98 : vector<16x16xf32>
    %cst_49 = arith.constant dense<0.000000e+00> : vector<16xf32>
    %100 = vector.multi_reduction <add>, %99, %cst_49 [0] : vector<16x16xf32> to vector<16xf32>
    %101 = vector.shape_cast %100 : vector<16xf32> to vector<1x16xf32>
    %cst_50 = arith.constant 6.250000e-02 : f32
    %102 = vector.broadcast %cst_50 : f32 to vector<1x16xf32>
    %103 = arith.mulf %101, %102 : vector<1x16xf32>
    %104 = arith.mulf %99, %99 : vector<16x16xf32>
    %cst_51 = arith.constant dense<0.000000e+00> : vector<16xf32>
    %105 = vector.multi_reduction <add>, %104, %cst_51 [0] : vector<16x16xf32> to vector<16xf32>
    %106 = vector.shape_cast %105 : vector<16xf32> to vector<1x16xf32>
    %cst_52 = arith.constant 6.250000e-02 : f32
    %107 = vector.broadcast %cst_52 : f32 to vector<1x16xf32>
    %108 = arith.mulf %106, %107 : vector<1x16xf32>
    %109 = arith.mulf %103, %103 : vector<1x16xf32>
    %110 = arith.subf %108, %109 : vector<1x16xf32>
    %cst_53 = arith.constant 0.000000e+00 : f32
    %111 = vector.broadcast %cst_53 : f32 to vector<1x16xf32>
    %112 = arith.maximumf %110, %111 : vector<1x16xf32>
    %c0_54 = arith.constant 0 : index
    %c0_55 = arith.constant 0 : index
    %113 = vector.load %arg17[%c0_54, %c0_55] : memref<1x16xf32, #tpu.memory_space<vmem>>, vector<1x16xf32>
    %cst_56 = arith.constant 9.99999974E-6 : f32
    %114 = vector.broadcast %cst_56 : f32 to vector<1x16xf32>
    %115 = arith.addf %112, %114 : vector<1x16xf32>
    %116 = math.rsqrt %115 : vector<1x16xf32>
    %117 = arith.mulf %113, %116 : vector<1x16xf32>
    %c0_57 = arith.constant 0 : index
    %c0_58 = arith.constant 0 : index
    %118 = vector.load %arg18[%c0_57, %c0_58] : memref<1x16xf32, #tpu.memory_space<vmem>>, vector<1x16xf32>
    %119 = arith.mulf %103, %117 : vector<1x16xf32>
    %120 = arith.subf %118, %119 : vector<1x16xf32>
    %121 = vector.broadcast %117 : vector<1x16xf32> to vector<16x16xf32>
    %122 = arith.mulf %99, %121 : vector<16x16xf32>
    %123 = vector.broadcast %120 : vector<1x16xf32> to vector<16x16xf32>
    %124 = arith.addf %122, %123 : vector<16x16xf32>
    %c0_59 = arith.constant 0 : index
    %c0_60 = arith.constant 0 : index
    %125 = vector.load %arg19[%c0_59, %c0_60] : memref<16x16xf32, #tpu.memory_space<vmem>>, vector<16x16xf32>
    tpu.vector_store %arg19[%c0_59, %c0_60], %124 {strides = array<i32>} : memref<16x16xf32, #tpu.memory_space<vmem>>, vector<16x16xf32>,
    return
  }
}

module attributes {stable_mosaic.version = 11 : i64} {
  func.func @_mlp_gumbel_kernel(%arg0: memref<2x128xf32, #tpu.memory_space<vmem>>, %arg1: memref<2x16xf32, #tpu.memory_space<vmem>>, %arg2: memref<2x32xf32, #tpu.memory_space<vmem>>, %arg3: memref<128x512xbf16, #tpu.memory_space<vmem>>, %arg4: memref<16x512xbf16, #tpu.memory_space<vmem>>, %arg5: memref<1x512xf32, #tpu.memory_space<vmem>>, %arg6: memref<512x256xbf16, #tpu.memory_space<vmem>>, %arg7: memref<1x256xf32, #tpu.memory_space<vmem>>, %arg8: memref<256x64xbf16, #tpu.memory_space<vmem>>, %arg9: memref<1x64xf32, #tpu.memory_space<vmem>>, %arg10: memref<64x32xbf16, #tpu.memory_space<vmem>>, %arg11: memref<1x32xf32, #tpu.memory_space<vmem>>, %arg12: memref<2x32xbf16, #tpu.memory_space<vmem>>) attributes {dimension_semantics = [], scalar_prefetch = 0 : i64, scratch_operands = 0 : i64, tpu.core_type = #tpu.core_type<tc>} {
    %c0 = arith.constant 0 : index
    %c0_0 = arith.constant 0 : index
    %0 = vector.load %arg0[%c0, %c0_0] : memref<2x128xf32, #tpu.memory_space<vmem>>, vector<2x128xf32>
    %1 = arith.truncf %0 : vector<2x128xf32> to vector<2x128xbf16>
    %c0_1 = arith.constant 0 : index
    %c0_2 = arith.constant 0 : index
    %2 = vector.load %arg3[%c0_1, %c0_2] : memref<128x512xbf16, #tpu.memory_space<vmem>>, vector<128x512xbf16>
    %cst = arith.constant dense<0.000000e+00> : vector<2x512xf32>
    %3 = tpu.matmul %1, %2, %cst {dimension_numbers = #tpu.dot_dimension_numbers<[1], [0], [0], [1], [0, 0, 1, 1], [], []>} : vector<2x128xbf16>, vector<128x512xbf16>, vector<2x512xf32> -> vector<2x512xf32>
    %c0_3 = arith.constant 0 : index
    %c0_4 = arith.constant 0 : index
    %4 = vector.load %arg1[%c0_3, %c0_4] : memref<2x16xf32, #tpu.memory_space<vmem>>, vector<2x16xf32>
    %5 = arith.truncf %4 : vector<2x16xf32> to vector<2x16xbf16>
    %c0_5 = arith.constant 0 : index
    %c0_6 = arith.constant 0 : index
    %6 = vector.load %arg4[%c0_5, %c0_6] : memref<16x512xbf16, #tpu.memory_space<vmem>>, vector<16x512xbf16>
    %cst_7 = arith.constant dense<0.000000e+00> : vector<2x512xf32>
    %7 = tpu.matmul %5, %6, %cst_7 {dimension_numbers = #tpu.dot_dimension_numbers<[1], [0], [0], [1], [0, 0, 1, 1], [], []>} : vector<2x16xbf16>, vector<16x512xbf16>, vector<2x512xf32> -> vector<2x512xf32>
    %8 = arith.addf %3, %7 : vector<2x512xf32>
    %c0_8 = arith.constant 0 : index
    %c0_9 = arith.constant 0 : index
    %9 = vector.load %arg5[%c0_8, %c0_9] : memref<1x512xf32, #tpu.memory_space<vmem>>, vector<1x512xf32>
    %10 = vector.broadcast %9 : vector<1x512xf32> to vector<2x512xf32>
    %11 = arith.addf %8, %10 : vector<2x512xf32>
    %cst_10 = arith.constant 2.000000e-01 : f32
    %12 = vector.broadcast %cst_10 : f32 to vector<2x512xf32>
    %13 = arith.mulf %12, %11 : vector<2x512xf32>
    %14 = arith.maximumf %11, %13 : vector<2x512xf32>
    %15 = arith.truncf %14 : vector<2x512xf32> to vector<2x512xbf16>
    %c0_11 = arith.constant 0 : index
    %c0_12 = arith.constant 0 : index
    %16 = vector.load %arg6[%c0_11, %c0_12] : memref<512x256xbf16, #tpu.memory_space<vmem>>, vector<512x256xbf16>
    %cst_13 = arith.constant dense<0.000000e+00> : vector<2x256xf32>
    %17 = tpu.matmul %15, %16, %cst_13 {dimension_numbers = #tpu.dot_dimension_numbers<[1], [0], [0], [1], [0, 0, 1, 1], [], []>} : vector<2x512xbf16>, vector<512x256xbf16>, vector<2x256xf32> -> vector<2x256xf32>
    %c0_14 = arith.constant 0 : index
    %c0_15 = arith.constant 0 : index
    %18 = vector.load %arg7[%c0_14, %c0_15] : memref<1x256xf32, #tpu.memory_space<vmem>>, vector<1x256xf32>
    %19 = vector.broadcast %18 : vector<1x256xf32> to vector<2x256xf32>
    %20 = arith.addf %17, %19 : vector<2x256xf32>
    %cst_16 = arith.constant 2.000000e-01 : f32
    %21 = vector.broadcast %cst_16 : f32 to vector<2x256xf32>
    %22 = arith.mulf %21, %20 : vector<2x256xf32>
    %23 = arith.maximumf %20, %22 : vector<2x256xf32>
    %24 = arith.truncf %23 : vector<2x256xf32> to vector<2x256xbf16>
    %c0_17 = arith.constant 0 : index
    %c0_18 = arith.constant 0 : index
    %25 = vector.load %arg8[%c0_17, %c0_18] : memref<256x64xbf16, #tpu.memory_space<vmem>>, vector<256x64xbf16>
    %cst_19 = arith.constant dense<0.000000e+00> : vector<2x64xf32>
    %26 = tpu.matmul %24, %25, %cst_19 {dimension_numbers = #tpu.dot_dimension_numbers<[1], [0], [0], [1], [0, 0, 1, 1], [], []>} : vector<2x256xbf16>, vector<256x64xbf16>, vector<2x64xf32> -> vector<2x64xf32>
    %c0_20 = arith.constant 0 : index
    %c0_21 = arith.constant 0 : index
    %27 = vector.load %arg9[%c0_20, %c0_21] : memref<1x64xf32, #tpu.memory_space<vmem>>, vector<1x64xf32>
    %28 = vector.broadcast %27 : vector<1x64xf32> to vector<2x64xf32>
    %29 = arith.addf %26, %28 : vector<2x64xf32>
    %cst_22 = arith.constant 2.000000e-01 : f32
    %30 = vector.broadcast %cst_22 : f32 to vector<2x64xf32>
    %31 = arith.mulf %30, %29 : vector<2x64xf32>
    %32 = arith.maximumf %29, %31 : vector<2x64xf32>
    %33 = arith.truncf %32 : vector<2x64xf32> to vector<2x64xbf16>
    %c0_23 = arith.constant 0 : index
    %c0_24 = arith.constant 0 : index
    %34 = vector.load %arg10[%c0_23, %c0_24] : memref<64x32xbf16, #tpu.memory_space<vmem>>, vector<64x32xbf16>
    %cst_25 = arith.constant dense<0.000000e+00> : vector<2x32xf32>
    %35 = tpu.matmul %33, %34, %cst_25 {dimension_numbers = #tpu.dot_dimension_numbers<[1], [0], [0], [1], [0, 0, 1, 1], [], []>} : vector<2x64xbf16>, vector<64x32xbf16>, vector<2x32xf32> -> vector<2x32xf32>
    %c0_26 = arith.constant 0 : index
    %c0_27 = arith.constant 0 : index
    %36 = vector.load %arg11[%c0_26, %c0_27] : memref<1x32xf32, #tpu.memory_space<vmem>>, vector<1x32xf32>
    %37 = vector.broadcast %36 : vector<1x32xf32> to vector<2x32xf32>
    %38 = arith.addf %35, %37 : vector<2x32xf32>
    %c0_28 = arith.constant 0 : index
    %c0_29 = arith.constant 0 : index
    %39 = vector.load %arg2[%c0_28, %c0_29] : memref<2x32xf32, #tpu.memory_space<vmem>>, vector<2x32xf32>
    %40 = arith.addf %38, %39 : vector<2x32xf32>
    %41 = vector.extract_strided_slice %40 {offsets = [0, 0], sizes = [2, 8], strides = [1, 1]} : vector<2x32xf32> to vector<2x8xf32>
    %42 = vector.extract_strided_slice %40 {offsets = [0, 8], sizes = [2, 8], strides = [1, 1]} : vector<2x32xf32> to vector<2x8xf32>
    %43 = vector.extract_strided_slice %40 {offsets = [0, 16], sizes = [2, 8], strides = [1, 1]} : vector<2x32xf32> to vector<2x8xf32>
    %44 = vector.extract_strided_slice %40 {offsets = [0, 24], sizes = [2, 8], strides = [1, 1]} : vector<2x32xf32> to vector<2x8xf32>
    %45 = arith.maximumf %41, %42 : vector<2x8xf32>
    %46 = arith.maximumf %45, %43 : vector<2x8xf32>
    %47 = arith.maximumf %46, %44 : vector<2x8xf32>
    %cst_30 = arith.constant 0.000000e+00 : f32
    %48 = vector.broadcast %cst_30 : f32 to vector<2x8xf32>
    %49 = arith.cmpf oge, %41, %47 : vector<2x8xf32>
    %cst_31 = arith.constant 5.000000e-01 : f32
    %50 = vector.broadcast %cst_31 : f32 to vector<2x8xf32>
    %51 = arith.cmpf olt, %48, %50 : vector<2x8xf32>
    %52 = arith.andi %49, %51 : vector<2x8xi1>
    %53 = arith.extui %52 : vector<2x8xi1> to vector<2x8xi32>
    %54 = arith.sitofp %53 : vector<2x8xi32> to vector<2x8xf32>
    %55 = arith.addf %48, %54 : vector<2x8xf32>
    %56 = arith.cmpf oge, %42, %47 : vector<2x8xf32>
    %cst_32 = arith.constant 5.000000e-01 : f32
    %57 = vector.broadcast %cst_32 : f32 to vector<2x8xf32>
    %58 = arith.cmpf olt, %55, %57 : vector<2x8xf32>
    %59 = arith.andi %56, %58 : vector<2x8xi1>
    %60 = arith.extui %59 : vector<2x8xi1> to vector<2x8xi32>
    %61 = arith.sitofp %60 : vector<2x8xi32> to vector<2x8xf32>
    %62 = arith.addf %55, %61 : vector<2x8xf32>
    %63 = arith.cmpf oge, %43, %47 : vector<2x8xf32>
    %cst_33 = arith.constant 5.000000e-01 : f32
    %64 = vector.broadcast %cst_33 : f32 to vector<2x8xf32>
    %65 = arith.cmpf olt, %62, %64 : vector<2x8xf32>
    %66 = arith.andi %63, %65 : vector<2x8xi1>
    %67 = arith.extui %66 : vector<2x8xi1> to vector<2x8xi32>
    %68 = arith.sitofp %67 : vector<2x8xi32> to vector<2x8xf32>
    %69 = arith.addf %62, %68 : vector<2x8xf32>
    %70 = arith.cmpf oge, %44, %47 : vector<2x8xf32>
    %cst_34 = arith.constant 5.000000e-01 : f32
    %71 = vector.broadcast %cst_34 : f32 to vector<2x8xf32>
    %72 = arith.cmpf olt, %69, %71 : vector<2x8xf32>
    %73 = arith.andi %70, %72 : vector<2x8xi1>
    %74 = arith.extui %73 : vector<2x8xi1> to vector<2x8xi32>
    %75 = arith.sitofp %74 : vector<2x8xi32> to vector<2x8xf32>
    %76 = tpu.concatenate %54, %61, %68, %75 in 1 : vector<2x8xf32>, vector<2x8xf32>, vector<2x8xf32>, vector<2x8xf32> -> vector<2x32xf32>
    %77 = arith.truncf %76 : vector<2x32xf32> to vector<2x32xbf16>
    %c0_35 = arith.constant 0 : index
    %c0_36 = arith.constant 0 : index
    %78 = vector.load %arg12[%c0_35, %c0_36] : memref<2x32xbf16, #tpu.memory_space<vmem>>, vector<2x32xbf16>
    tpu.vector_store %arg12[%c0_35, %c0_36], %77 {strides = array<i32>} : memref<2x32xbf16, #tpu.memory_space<vmem>>, vector<2x32xbf16>,
    return
  }
}

</mosaic_0001>

<bundles_post_ra>
// kernel: generator_forward.2
= control target key start
LH: loop header
LB: loop body
LE: loop exit
PB: predicated region body
PF: predicated region fallthrough
CT: control target
= control target key end

     0   :  { %s1591_s0 = inlined_call_operand.hbm [shape: f32[16,32], index: 0, kind: input, shape index: {}]   ;;  %s1592_s1 = inlined_call_operand.vmem [shape: bf16[16,1], index: 1, kind: input, shape index: {}]   ;;  %s1593_s2 = inlined_call_operand.vmem [shape: bf16[16,1], index: 2, kind: input, shape index: {}]   ;;  %s1594_s3 = inlined_call_operand.vmem [shape: bf16[32,8], index: 3, kind: input, shape index: {}]   ;;  %s1595_s4 = inlined_call_operand.vmem [shape: bf16[32,8], index: 4, kind: input, shape index: {}]   ;;  %s1596_s5 = inlined_call_operand.vmem [shape: bf16[32,8], index: 5, kind: input, shape index: {}]   ;;  %s1597_s6 = inlined_call_operand.hbm [shape: f32[1,8], index: 6, kind: input, shape index: {}]   ;;  %s1598_s7 = inlined_call_operand.vmem [shape: bf16[8,2], index: 7, kind: input, shape index: {}]   ;;  %s1599_s8 = inlined_call_operand.vmem [shape: bf16[8,2], index: 8, kind: input, shape index: {}]   ;;  %s1600_s9 = inlined_call_operand.vmem [shape: bf16[8,2], index: 9, kind: input, shape index: {}]   ;;  %s1601_s10 = inlined_call_operand.hbm [shape: f32[1,2], index: 10, kind: input, shape index: {}]   ;;  %s1602_s11 = inlined_call_operand.hbm [shape: f32[1,2], index: 11, kind: input, shape index: {}]   ;;  %s1603_s12 = inlined_call_operand.hbm [shape: f32[1,2], index: 12, kind: input, shape index: {}]   ;;  %s1604_s13 = inlined_call_operand.hbm [shape: bf16[2,16], index: 13, kind: input, shape index: {}]   ;;  %s1605_s14 = inlined_call_operand.hbm [shape: bf16[2,16], index: 14, kind: input, shape index: {}]   ;;  %s1606_s15 = inlined_call_operand.hbm [shape: bf16[2,16], index: 15, kind: input, shape index: {}]   ;;  %s1607_s16 = inlined_call_operand.hbm [shape: f32[1,16], index: 16, kind: input, shape index: {}]   ;;  %s1608_s17 = inlined_call_operand.hbm [shape: f32[1,16], index: 17, kind: input, shape index: {}]   ;;  %s1609_s18 = inlined_call_operand.hbm [shape: f32[1,16], index: 18, kind: input, shape index: {}]   ;;  %s1610_s19 = inlined_call_operand.vmem [shape: f32[16,16], index: 19, kind: output, shape index: {}]  }
   0x1   :  { %1614 = sst [smem:[#allocation25_spill]] %s1591_s0 }
   0x2   :  { %1615 = sst [smem:[#allocation26_spill]] %s1592_s1 }
   0x3   :  { %1616 = sst [smem:[#allocation27_spill]] %s1593_s2 }
   0x4   :  { %1617 = sst [smem:[#allocation28_spill]] %s1594_s3 }
   0x5   :  { %24 = vsyncpa [#allocation3], 0 }
   0x6   :  { %25 = vsyncpa [#allocation5], 0 }
   0x7   :  { %26 = vsyncpa [#allocation8], 0 }
   0x8   :  { %27 = vsyncpa [#allocation11], 0 }
   0x9   :  { %28 = vsyncpa [#allocation14], 0 }
   0xa   :  { %29 = vsyncpa [#allocation17], 0  ;;  %s1300_s0 = smov [#allocation4]   ;;  %s1301_s20 = smov [#allocation7]  }
   0xb   :  { %s58_s30 = sshll.u32 %s1300_s0, 4  ;;  %s84_s21 = sshll.u32 %s1301_s20, 4  ;;  %s59_s30 = int_to_ptr.vmem [resolvable:$true] %s58_s30  ;;  %s85_s21 = int_to_ptr.vmem [resolvable:$true] %s84_s21 }
   0xc   :  { %s1076_s1 = scalar_lea.vmem %s59_s30, 16  ;;  %s1080_s22 = scalar_lea.vmem %s59_s30, 32 }
   0xd   :  { %p1077_p0 = scmp.ne.s32.totalorder %s59_s30, %s1076_s1  ;;  %p1081_p1 = scmp.lt.s32.totalorder %s59_s30, %s59_s30 }
   0xe   :  { %p1082_p2 = scmp.lt.s32.totalorder %s1080_s22, %s1076_s1 }
  0x10   :  { %p1083_p3 = por %p1082_p2, %p1081_p1 }
  0x12   :  { %p1084_p4 = pnand %p1083_p3, %p1077_p0 }
  0x14   :  { %1087 = shalt.err (!%p1084_p4)
}
  0x15   :  { %61 = dma.hbm_to_vmem [thread:$0]  %s1597_s6, 16, %s59_s30, [#allocation5]  }
  0x16   :  { %s1096_s24 = scalar_lea.vmem %s85_s21, 16  ;;  %s1100_s25 = scalar_lea.vmem %s85_s21, 32 }
  0x17   :  { %p1097_p5 = scmp.ne.s32.totalorder %s85_s21, %s1096_s24  ;;  %p1101_p6 = scmp.lt.s32.totalorder %s85_s21, %s85_s21 }
  0x18   :  { %p1102_p7 = scmp.lt.s32.totalorder %s1100_s25, %s1096_s24 }
  0x1a   :  { %p1103_p8 = por %p1102_p7, %p1101_p6 }
  0x1c   :  { %p1104_p9 = pnand %p1103_p8, %p1097_p5 }
  0x1e   :  { %1107 = shalt.err (!%p1104_p9)
}
  0x1f   :  { %87 = dma.hbm_to_vmem [thread:$0]  %s1602_s11, 16, %s85_s21, [#allocation8]  }
  0x20   :  { %s1302_s27 = smov [#allocation10]   ;;  %s1303_s29 = smov [#allocation13]  }
  0x21   :  { %s104_s28 = sshll.u32 %s1302_s27, 4  ;;  %s124_s0 = sshll.u32 %s1303_s29, 4  ;;  %s105_s28 = int_to_ptr.vmem [resolvable:$true] %s104_s28  ;;  %s125_s0 = int_to_ptr.vmem [resolvable:$true] %s124_s0 }
  0x22   :  { %s1116_s20 = scalar_lea.vmem %s105_s28, 16  ;;  %s1120_s6 = scalar_lea.vmem %s105_s28, 32 }
  0x23   :  { %p1117_p10 = scmp.ne.s32.totalorder %s105_s28, %s1116_s20  ;;  %p1121_p11 = scmp.lt.s32.totalorder %s105_s28, %s105_s28 }
  0x24   :  { %p1122_p12 = scmp.lt.s32.totalorder %s1120_s6, %s1116_s20 }
  0x26   :  { %p1123_p13 = por %p1122_p12, %p1121_p11 }
  0x28   :  { %p1124_p0 = pnand %p1123_p13, %p1117_p10 }
  0x2a   :  { %1127 = shalt.err (!%p1124_p0)
}
  0x2b   :  { %107 = dma.hbm_to_vmem [thread:$0]  %s1604_s13, 16, %s105_s28, [#allocation11]  }
  0x2c   :  { %s1136_s22 = scalar_lea.vmem %s125_s0, 16  ;;  %s1140_s11 = scalar_lea.vmem %s125_s0, 32 }
  0x2d   :  { %p1137_p1 = scmp.ne.s32.totalorder %s125_s0, %s1136_s22  ;;  %p1141_p2 = scmp.lt.s32.totalorder %s125_s0, %s125_s0 }
  0x2e   :  { %p1142_p3 = scmp.lt.s32.totalorder %s1140_s11, %s1136_s22 }
  0x30   :  { %p1143_p4 = por %p1142_p3, %p1141_p2 }
  0x32   :  { %p1144_p5 = pnand %p1143_p4, %p1137_p1 }
  0x34   :  { %1147 = shalt.err (!%p1144_p5)
}
  0x35   :  { %127 = dma.hbm_to_vmem [thread:$0]  %s1606_s15, 16, %s125_s0, [#allocation14]  }
  0x36   :  { %s1304_s23 = smov [#allocation16]   ;;  %s1305_s25 = smov [#allocation2]  }
  0x37   :  { %s144_s24 = sshll.u32 %s1304_s23, 4  ;;  %s35_s3 = sshll.u32 %s1305_s25, 4  ;;  %s145_s24 = int_to_ptr.vmem [resolvable:$true] %s144_s24  ;;  %s36_s3 = int_to_ptr.vmem [resolvable:$true] %s35_s3 }
  0x38   :  { %s1156_s26 = scalar_lea.vmem %s145_s24, 16  ;;  %s1160_s13 = scalar_lea.vmem %s145_s24, 32 }
  0x39   :  { %p1157_p6 = scmp.ne.s32.totalorder %s145_s24, %s1156_s26  ;;  %p1161_p7 = scmp.lt.s32.totalorder %s145_s24, %s145_s24 }
  0x3a   :  { %p1162_p8 = scmp.lt.s32.totalorder %s1160_s13, %s1156_s26 }
  0x3c   :  { %p1163_p9 = por %p1162_p8, %p1161_p7 }
  0x3e   :  { %p1164_p10 = pnand %p1163_p9, %p1157_p6 }
  0x40   :  { %1167 = shalt.err (!%p1164_p10)
}
  0x41   :  { %147 = dma.hbm_to_vmem [thread:$0]  %s1608_s17, 16, %s145_s24, [#allocation17]  }
  0x42   :  { %s1176_s29 = scalar_lea.vmem %s36_s3, 256  ;;  %p1181_p12 = scmp.lt.s32.totalorder %s36_s3, %s36_s3 }
  0x43   :  { %p1177_p11 = scmp.ne.s32.totalorder %s36_s3, %s1176_s29  ;;  %p1182_p13 = scmp.lt.s32.totalorder %s1176_s29, %s1176_s29 }
  0x45   :  { %p1183_p0 = por %p1182_p13, %p1181_p12 }
  0x47   :  { %p1184_p1 = pnand %p1183_p0, %p1177_p11 }
  0x49   :  { %1187 = shalt.err (!%p1184_p1)
}
  0x4a   :  { %s1306_s15 = smov 128   ;;  %s1307_s0 = smov 8  }
  0x4b   :  { %s1618_s30 = sld [smem:[#allocation25_spill]]  ;;  %s1308_s1 = smov [#allocation6]  }
  0x4c   :  { %s74_s22 = sshll.u32 %s1308_s1, 4  ;;  %s1309_s11 = smov [#allocation9]   ;;  %s75_s22 = int_to_ptr.vmem [resolvable:$true] %s74_s22 }
  0x4d   :  { %s94_s21 = sshll.u32 %s1309_s11, 4  ;;  %s1196_s17 = scalar_lea.vmem %s75_s22, 16  ;;  %s95_s21 = int_to_ptr.vmem [resolvable:$true] %s94_s21 }
  0x4e   :  { %p1197_p2 = scmp.ne.s32.totalorder %s75_s22, %s1196_s17  ;;  %s1200_s2 = scalar_lea.vmem %s75_s22, 32 }
  0x4f   :  { %p1201_p3 = scmp.lt.s32.totalorder %s75_s22, %s75_s22  ;;  %p1202_p4 = scmp.lt.s32.totalorder %s1200_s2, %s1196_s17 }
  0x51   :  { %41 = dma.hbm_to_vmem [thread:$0]  %s1618_s30, 256, %s36_s3, [#allocation3], %s1306_s15, %s1306_s15, %s1307_s0  }
  0x52   :  { %p1203_p5 = por %p1202_p4, %p1201_p3 }
  0x54   :  { %p1204_p6 = pnand %p1203_p5, %p1197_p2 }
  0x56   :  { %1207 = shalt.err (!%p1204_p6)
}
  0x57   :  { %77 = dma.hbm_to_vmem [thread:$0]  %s1601_s10, 16, %s75_s22, [#allocation5]  }
  0x58   :  { %s1216_s25 = scalar_lea.vmem %s95_s21, 16  ;;  %s1220_s3 = scalar_lea.vmem %s95_s21, 32 }
  0x59   :  { %p1217_p7 = scmp.ne.s32.totalorder %s95_s21, %s1216_s25  ;;  %p1221_p8 = scmp.lt.s32.totalorder %s95_s21, %s95_s21 }
  0x5a   :  { %p1222_p9 = scmp.lt.s32.totalorder %s1220_s3, %s1216_s25 }
  0x5c   :  { %p1223_p10 = por %p1222_p9, %p1221_p8 }
  0x5e   :  { %p1224_p11 = pnand %p1223_p10, %p1217_p7 }
  0x60   :  { %1227 = shalt.err (!%p1224_p11)
}
  0x61   :  { %97 = dma.hbm_to_vmem [thread:$0]  %s1603_s12, 16, %s95_s21, [#allocation8]  }
  0x62   :  { %s1310_s27 = smov [#allocation12]   ;;  %s1311_s29 = smov [#allocation15]  }
  0x63   :  { %s114_s28 = sshll.u32 %s1310_s27, 4  ;;  %s134_s15 = sshll.u32 %s1311_s29, 4  ;;  %s115_s28 = int_to_ptr.vmem [resolvable:$true] %s114_s28  ;;  %s135_s15 = int_to_ptr.vmem [resolvable:$true] %s134_s15 }
  0x64   :  { %s1236_s0 = scalar_lea.vmem %s115_s28, 16  ;;  %s1240_s10 = scalar_lea.vmem %s115_s28, 32 }
  0x65   :  { %p1237_p12 = scmp.ne.s32.totalorder %s115_s28, %s1236_s0  ;;  %p1241_p13 = scmp.lt.s32.totalorder %s115_s28, %s115_s28 }
  0x66   :  { %p1242_p0 = scmp.lt.s32.totalorder %s1240_s10, %s1236_s0 }
  0x68   :  { %p1243_p1 = por %p1242_p0, %p1241_p13 }
  0x6a   :  { %p1244_p2 = pnand %p1243_p1, %p1237_p12 }
  0x6c   :  { %1247 = shalt.err (!%p1244_p2)
}
  0x6d   :  { %117 = dma.hbm_to_vmem [thread:$0]  %s1605_s14, 16, %s115_s28, [#allocation11]  }
  0x6e   :  { %s1256_s30 = scalar_lea.vmem %s135_s15, 16  ;;  %s1260_s12 = scalar_lea.vmem %s135_s15, 32 }
  0x6f   :  { %p1257_p3 = scmp.ne.s32.totalorder %s135_s15, %s1256_s30  ;;  %p1261_p4 = scmp.lt.s32.totalorder %s135_s15, %s135_s15 }
  0x70   :  { %p1262_p5 = scmp.lt.s32.totalorder %s1260_s12, %s1256_s30 }
  0x72   :  { %p1263_p6 = por %p1262_p5, %p1261_p4 }
  0x74   :  { %p1264_p7 = pnand %p1263_p6, %p1257_p3 }
  0x76   :  { %1267 = shalt.err (!%p1264_p7)
}
  0x77   :  { %137 = dma.hbm_to_vmem [thread:$0]  %s1607_s16, 16, %s135_s15, [#allocation14]  }
  0x78   :  { %s1312_s11 = smov [#allocation18]  }
  0x79   :  { %s154_s21 = sshll.u32 %s1312_s11, 4  ;;  %s155_s21 = int_to_ptr.vmem [resolvable:$true] %s154_s21 }
  0x7a   :  { %s1276_s17 = scalar_lea.vmem %s155_s21, 16  ;;  %s1280_s2 = scalar_lea.vmem %s155_s21, 32 }
  0x7b   :  { %p1277_p8 = scmp.ne.s32.totalorder %s155_s21, %s1276_s17  ;;  %p1281_p9 = scmp.lt.s32.totalorder %s155_s21, %s155_s21 }
  0x7c   :  { %p1282_p10 = scmp.lt.s32.totalorder %s1280_s2, %s1276_s17 }
  0x7e   :  { %p1283_p11 = por %p1282_p10, %p1281_p9 }
  0x80   :  { %p1284_p12 = pnand %p1283_p11, %p1277_p8 }
  0x82   :  { %1287 = shalt.err (!%p1284_p12)
}
  0x83   :  { %157 = dma.hbm_to_vmem [thread:$0]  %s1609_s18, 16, %s155_s21, [#allocation17]  }
  0x84   :  { %1288 = dma.done.wait [#allocation3], 256  }
  0x85   :  { %1289 = vsyncadd [#allocation3], 4294967040 }
  0x86   :  { %1290 = dma.done.wait [#allocation5], 32  }
  0x87   :  { %1291 = vsyncadd [#allocation5], 4294967264 }
  0x88   :  { %1292 = dma.done.wait [#allocation8], 32  }
  0x89   :  { %1293 = vsyncadd [#allocation8], 4294967264 }
  0x8a   :  { %1294 = dma.done.wait [#allocation11], 32  }
  0x8b   :  { %1295 = vsyncadd [#allocation11], 4294967264 }
  0x8c   :  { %1296 = dma.done.wait [#allocation14], 32  }
  0x8d   :  { %1297 = vsyncadd [#allocation14], 4294967264 }
  0x8e   :  { %1298 = dma.done.wait [#allocation17], 32  }
  0x8f   :  { %1299 = vsyncadd [#allocation17], 4294967264  ;;  %v1313_v0 = vmov 0   ;;  %v1314_v1 = vmov 0.0   ;;  %vm1315_vm0 = vmmov 0   ;;  %s1619_s24 = sld [smem:[#allocation27_spill]]  ;;  %v220_v17 = vlaneseq }
  0x90   :  { %1057 = vset.pattern.permute.xlu1 %v1313_v0  ;;  %1056 = vset.pattern.permute.xlu0 %v1313_v0  ;;  %s1620_s26 = sld [smem:[#allocation26_spill]]  ;;  %v1058_v6 = vld [vmem:[%s1595_s4 + $0x8] sm:$0xff]   ;;  %v1059_v7 = vld [vmem:[%s1595_s4] sm:$0xff]   ;;  %vm302_vm1 = vcmask 261120   ;;  %v1316_v15 = vmov 839922192  }
  0x91   :  { %979 = vmatprep.subr.bf16.mxu0 %v1314_v1  ;;  %983 = vmatprep.mubr.msk.bf16.mxu0 %vm1315_vm0, %v1314_v1  ;;  %v196_v8 = vld [vmem:[#allocation2] sm:$0xff]  ;;  %v197_v9 = vld [vmem:[#allocation2 + $0x8] sm:$0xff]  ;;  %s1621_s12 = sld [smem:[#allocation28_spill]]  ;;  %v218_v16 = vunpack.c.l.s4 %v1316_v15  ;;  %v1495_v21 = vshrl.u32 %v220_v17, 7  ;;  %vm247_vm2 = vcmask 1047552   ;;  %vm208_vm4 = vcmask 1040384  }
  0x92   :  { %987 = vmatprep.subr.bf16.mxu1 %v1314_v1  ;;  %991 = vmatprep.mubr.msk.bf16.mxu1 %vm1315_vm0, %v1314_v1  ;;  %v198_v11 = vpack.c.bf16 %v197_v9, %v196_v8  ;;  %v1061_v13 = vld [vmem:[%s1596_s5 + $0x8] sm:$0xff]   ;;  %v1063_v14 = vld [vmem:[%s1596_s5] sm:$0xff]   ;;  %vm248_vm3 = vsmask.f32 7424  ;;  %vm209_vm5 = vsmask.f32 256 }
  0x93   :  { %980 = vmatpush3.bf16.msra.mxu0 %v1058_v6  ;;  %v219_v20 = vunpack.c.0.s8 %v218_v16  ;;  %vm1498_vm6 = vmand %vm247_vm2, %vm248_vm3  ;;  %v496_v47 = vld [vmem:[%s1599_s8] sm:$0xf]  ;;  %vm500_vm8 = vcmask 1043456   ;;  %v949_v54 = vld [vmem:[#allocation4] ss:$0 sm:$0xff]  ;;  %vm497_vm9 = vcmask 64512  }
  0x94   :  { %981 = vmatprep.subr.bf16.mxu0 %v1314_v1  ;;  %v200_v18 = vshrl.u32 %v198_v11, 16  ;;  %v204_v19 = vshll.u32 %v198_v11, 16  ;;  %vm1503_vm7 = vmand %vm208_vm4, %vm209_vm5  ;;  %v502_v48 = vsel %vm500_vm8, %v496_v47, 0  ;;  %v495_v49 = vld [vmem:[%s1598_s7] sm:$0xf]  ;;  %vm651_vm10 = vcmask 15360  }
  0x95   :  { %v194_v2 = vld [vmem:[%s1619_s24] sm:$0xf]  ;;  %v195_v4 = vld [vmem:[%s1619_s24 + $0x4] sm:$0xf]  ;;  %v222_v26 = vsub.s32 %v219_v20, %v1495_v21  ;;  %v549_v50 = vsel %vm500_vm8, %v495_v49, 0  ;;  %vm877_vm11 = vcmask 130048  }
  0x96   :  { %v192_v3 = vld [vmem:[%s1620_s26] sm:$0xf]  ;;  %253 = vperm.xlu1 %1057, %v194_v2   ;;  %v193_v5 = vld [vmem:[%s1620_s26 + $0x4] sm:$0xf]  ;;  %v243_v22 = vrot.slane %v204_v19, 1  ;;  %v202_v23 = vrot.slane %v200_v18, 7 }
  0x97   :  { %214 = vperm.xlu0 %1056, %v192_v3   ;;  %v1060_v10 = vld [vmem:[%s1621_s12 + $0x8] sm:$0xff]   ;;  %v1062_v12 = vld [vmem:[%s1621_s12] sm:$0xff]   ;;  %982 = vmatpush3.bf16.msra.mxu0 %v1059_v7  ;;  %v723_v20 = vld [vmem:[#allocation12] sm:$0x1] }
  0x98   :  { %988 = vmatpush3.bf16.msra.mxu1 %v1060_v10  ;;  %995 = vmatprep.subr.bf16.mxu0 %v1314_v1  ;;  %v244_v27 = vor.u32 %v243_v22, %v200_v18  ;;  %v206_v29 = vor.u32 %v204_v19, %v202_v23  ;;  %v957_v30 = vld [vmem:[#allocation15] ss:$0 sm:$0xff] }
  0x99   :  { %989 = vmatprep.subr.bf16.mxu1 %v1314_v1 }
  0x9a   :  { %265 = vperm.xlu1 %1057, %v195_v4   ;;  %984 = vmatmul.mubr.msk.bf16.vlgmr.msra.gmra.mxu0 %vm302_vm1, %v198_v11  ;;  %v250_v37 = vsel %vm1498_vm6, %v244_v27, %v243_v22  ;;  %v211_v38 = vsel %vm1503_vm7, %v202_v23, %v206_v29  ;;  %v728_v22 = vsel %vm208_vm4, %v723_v20, 0  ;;  %v722_v23 = vld [vmem:[#allocation10] sm:$0x1] }
  0x9b   :  { %226 = vperm.xlu0 %1056, %v193_v5   ;;  %996 = vmatpush3.bf16.msra.mxu0 %v1061_v13  ;;  %v592_v5 = vld [vmem:[%s1600_s9] sm:$0xf] }
  0x9c   :  { %990 = vmatpush3.bf16.msra.mxu1 %v1062_v12  ;;  %999 = vmatprep.mubr.msk.bf16.mxu0 %vm1315_vm0, %v1314_v1  ;;  %v597_v9 = vsel %vm500_vm8, %v592_v5, 0 }
  0x9d   :  { %1003 = vmatprep.subr.bf16.mxu1 %v1314_v1  ;;  %997 = vmatprep.subr.bf16.mxu0 %v1314_v1 }
  0x9f   :  { %998 = vmatpush3.bf16.msra.mxu0 %v1063_v14 }
  0xa0   :  { %1009 = vmatprep.subr.bf16.mxu0 %v1314_v1 }
 0x111   :  { %v254_v24 = vpop.permute.xlu1 %253 }
 0x112   :  { %v215_v25 = vpop.permute.xlu0 %214  ;;  %v262_v33 = vrot.slane %v254_v24, %v222_v26  ;;  %v775_v24 = vsel %vm208_vm4, %v722_v23, 0 }
 0x113   :  { %v223_v34 = vrot.slane %v215_v25, %v222_v26 }
 0x115   :  { %v266_v31 = vpop.permute.xlu1 %265 }
 0x116   :  { %v227_v32 = vpop.permute.xlu0 %226  ;;  %v274_v35 = vrot.slane %v266_v31, %v222_v26 }
 0x117   :  { %v235_v36 = vrot.slane %v227_v32, %v222_v26 }
 0x118   :  { %v1511_v39 = vcombine.low %v262_v33, %v274_v35 }
 0x119   :  { %v1513_v40 = vcombine.low %v223_v34, %v235_v36  ;;  %v953_v34 = vld [vmem:[#allocation6] ss:$0 sm:$0xff] }
 0x11a   :  { %v281_v41 = vmul.bf16 %v1511_v39, %v250_v37 }
 0x11b   :  { %v242_v42 = vmul.bf16 %v1513_v40, %v211_v38 }
 0x11c   :  { %1000 = vmatmul.mubr.msk.bf16.vlgmr.msra.gmra.mxu0 %vm302_vm1, %v281_v41 }
 0x11d   :  { %992 = vmatmul.mubr.msk.bf16.vlgmr.msra.gmra.mxu1 %vm302_vm1, %v242_v42  ;;  %1011 = vmatprep.mubr.msk.bf16.mxu0 %vm1315_vm0, %v1314_v1 }
 0x11e   :  { %1005 = vmatprep.mubr.msk.bf16.mxu1 %vm1315_vm0, %v1314_v1  ;;  %1004 = vmatpush3.bf16.msra.mxu1 %v502_v48 }
 0x11f   :  { %1015 = vmatprep.subr.bf16.mxu1 %v1314_v1  ;;  %1010 = vmatpush3.bf16.msra.mxu0 %v549_v50 }
 0x120   :  { %1021 = vmatprep.subr.bf16.mxu0 %v1314_v1 }
 0x15a   :  { %v339_v43 = vpop.f32.mrf.mxu0 }
 0x15c   :  { %v985_v44 = vpop.f32.mrf.mxu0 }
 0x15e   :  { %v342_v45 = vpop.f32.mrf.mxu0 }
 0x160   :  { %v986_v46 = vpop.f32.mrf.mxu0 }
 0x1dc   :  { %v455_v52 = vpop.f32.mrf.mxu0 }
 0x1dd   :  { %v395_v51 = vpop.f32.mrf.mxu1 }
 0x1de   :  { %v396_v53 = vadd.f32 %v395_v51, %v339_v43  ;;  %v1001_v56 = vpop.f32.mrf.mxu0 }
 0x1df   :  { %v993_v55 = vpop.f32.mrf.mxu1 }
 0x1e0   :  { %v462_v57 = vadd.f32 %v455_v52, %v396_v53  ;;  %v458_v59 = vpop.f32.mrf.mxu0 }
 0x1e1   :  { %v398_v58 = vpop.f32.mrf.mxu1 }
 0x1e2   :  { %v471_v60 = vadd.f32 %v949_v54, %v462_v57  ;;  %v399_v61 = vadd.f32 %v398_v58, %v342_v45  ;;  %v1002_v63 = vpop.f32.mrf.mxu0 }
 0x1e3   :  { %v994_v62 = vpop.f32.mrf.mxu1 }
 0x1e4   :  { %v463_v0 = vadd.f32 %v458_v59, %v399_v61  ;;  %v473_v2 = vmul.f32 0.2, %v471_v60 }
 0x1e6   :  { %v472_v3 = vadd.f32 %v949_v54, %v463_v0  ;;  %v475_v6 = vmax.f32 %v471_v60, %v473_v2 }
 0x1e8   :  { %v474_v4 = vmul.f32 0.2, %v472_v3 }
 0x1ea   :  { %v476_v7 = vmax.f32 %v472_v3, %v474_v4 }
 0x1ec   :  { %v477_v8 = vpack.c.bf16 %v476_v7, %v475_v6 }
 0x1ee   :  { %v479_v10 = vshrl.u32 %v477_v8, 16  ;;  %v483_v11 = vshll.u32 %v477_v8, 16  ;;  %1006 = vmatmul.mubr.msk.bf16.vlgmr.msra.gmra.mxu1 %vm497_vm9, %v477_v8 }
 0x1ef   :  { %1016 = vmatpush3.bf16.msra.mxu1 %v597_v9  ;;  %1017 = vmatprep.mubr.msk.bf16.mxu1 %vm1315_vm0, %v1314_v1 }
 0x1f0   :  { %v481_v12 = vrot.slane %v479_v10, 7  ;;  %v489_v13 = vrot.slane %v483_v11, 1  ;;  %1027 = vmatprep.subr.bf16.mxu1 %v1314_v1 }
 0x1f2   :  { %v485_v14 = vor.u32 %v483_v11, %v481_v12  ;;  %v490_v15 = vor.u32 %v489_v13, %v479_v10  ;;  %v677_v11 = vld [vmem:[#allocation7] sm:$0x1] }
 0x1f4   :  { %v487_v16 = vsel %vm1503_vm7, %v481_v12, %v485_v14  ;;  %v493_v17 = vsel %vm1498_vm6, %v490_v15, %v489_v13  ;;  %v1561_v12 = vsub.s32 0, %v1495_v21  ;;  %v681_v15 = vld [vmem:[#allocation9] sm:$0x1] }
 0x1f5   :  { %v488_v18 = vmul.bf16 %v1513_v40, %v487_v16  ;;  %v494_v19 = vmul.bf16 %v1511_v39, %v493_v17 }
 0x1f7   :  { %1012 = vmatmul.mubr.msk.bf16.vlgmr.msra.gmra.mxu0 %vm497_vm9, %v488_v18  ;;  %1018 = vmatmul.mubr.msk.bf16.vlgmr.msra.gmra.mxu1 %vm497_vm9, %v494_v19 }
 0x1f8   :  { %1023 = vmatprep.mubr.msk.bf16.mxu0 %vm1315_vm0, %v1314_v1  ;;  %1029 = vmatprep.mubr.msk.bf16.mxu1 %vm1315_vm0, %v1314_v1 }
 0x1f9   :  { %1022 = vmatpush3.bf16.msra.mxu0 %v728_v22  ;;  %1028 = vmatpush3.bf16.msra.mxu1 %v775_v24 }
 0x1fa   :  { %1033 = vmatprep.subr.bf16.mxu0 %v1314_v1 }
 0x2ae   :  { %v538_v25 = vpop.f32.mrf.mxu1 }
 0x2b0   :  { %v1007_v26 = vpop.f32.mrf.mxu1 }
 0x2b2   :  { %v541_v27 = vpop.f32.mrf.mxu1 }
 0x2b4   :  { %v1008_v29 = vpop.f32.mrf.mxu1 }
 0x2b7   :  { %v585_v31 = vpop.f32.mrf.mxu0  ;;  %v633_v32 = vpop.f32.mrf.mxu1 }
 0x2b8   :  { %v586_v33 = vadd.f32 %v585_v31, %v538_v25 }
 0x2b9   :  { %v1013_v35 = vpop.f32.mrf.mxu0  ;;  %v1019_v36 = vpop.f32.mrf.mxu1 }
 0x2ba   :  { %v640_v37 = vadd.f32 %v633_v32, %v586_v33 }
 0x2bb   :  { %v588_v38 = vpop.f32.mrf.mxu0  ;;  %v636_v41 = vpop.f32.mrf.mxu1 }
 0x2bc   :  { %v649_v42 = vadd.f32 %v953_v34, %v640_v37  ;;  %v589_v43 = vadd.f32 %v588_v38, %v541_v27  ;;  %v818_v27 = vld [vmem:[#allocation13] sm:$0x1] }
 0x2bd   :  { %v1014_v44 = vpop.f32.mrf.mxu0  ;;  %v1020_v45 = vpop.f32.mrf.mxu1  ;;  %v823_v32 = vsel %vm208_vm4, %v818_v27, 0  ;;  %v907_v27 = vld [vmem:[#allocation18] sm:$0x1] }
 0x2be   :  { %v641_v46 = vadd.f32 %v636_v41, %v589_v43  ;;  %v662_v47 = vmul.f32 %v649_v42, %v649_v42  ;;  %v652_v49 = vsel %vm651_vm10, %v649_v42, 0.0 }
 0x2c0   :  { %v650_v48 = vadd.f32 %v953_v34, %v641_v46  ;;  %v664_v53 = vsel %vm651_vm10, %v662_v47, 0.0 }
 0x2c2   :  { %v653_v50 = vsel %vm651_vm10, %v650_v48, 0.0  ;;  %v663_v51 = vmul.f32 %v650_v48, %v650_v48 }
 0x2c3   :  { %v654_v52 = vadd.f32 %v653_v50, %v652_v49 }
 0x2c4   :  { %v665_v54 = vsel %vm651_vm10, %v663_v51, 0.0 }
 0x2c5   :  { %v655_v55 = vrot.slane %v654_v52, 4  ;;  %v666_v56 = vadd.f32 %v665_v54, %v664_v53 }
 0x2c7   :  { %v656_v57 = vadd.f32 %v655_v55, %v654_v52  ;;  %v667_v58 = vrot.slane %v666_v56, 4 }
 0x2c9   :  { %v657_v59 = vrot.slane %v656_v57, 2  ;;  %v668_v60 = vadd.f32 %v667_v58, %v666_v56 }
 0x2cb   :  { %v658_v61 = vadd.f32 %v657_v59, %v656_v57  ;;  %v669_v62 = vrot.slane %v668_v60, 2 }
 0x2cd   :  { %v659_v63 = vrot.slane %v658_v61, 1  ;;  %v670_v0 = vadd.f32 %v669_v62, %v668_v60 }
 0x2cf   :  { %v660_v2 = vadd.f32 %v659_v63, %v658_v61  ;;  %v671_v3 = vrot.slane %v670_v0, 1 }
 0x2d1   :  { %v661_v4 = vmul.f32 0.0625, %v660_v2  ;;  %v672_v5 = vadd.f32 %v671_v3, %v670_v0 }
 0x2d3   :  { %v673_v6 = vmul.f32 0.0625, %v672_v5  ;;  %v674_v7 = vmul.f32 %v661_v4, %v661_v4 }
 0x2d5   :  { %v675_v8 = vsub.f32 %v673_v6, %v674_v7 }
 0x2d7   :  { %v676_v9 = vmax.f32 %v675_v8, 0.0 }
 0x2d9   :  { %v678_v10 = vadd.f32 1e-05, %v676_v9 }
 0x2db   :  { %1064 = vrsqrt.f32 %v678_v10 }
 0x2e8   :  { %v1065_v13 = vpop.eup %1064 }
 0x2e9   :  { %v680_v14 = vmul.f32 %v1065_v13, %v677_v11 }
 0x2eb   :  { %v682_v16 = vmul.f32 %v680_v14, %v661_v4  ;;  %v688_v17 = vrot.slane %v680_v14, %v1561_v12 }
 0x2ed   :  { %v683_v18 = vsub.f32 %v681_v15, %v682_v16  ;;  %v690_v19 = vmul.f32 %v688_v17, %v649_v42  ;;  %v691_v20 = vmul.f32 %v688_v17, %v650_v48 }
 0x2ef   :  { %v696_v22 = vrot.slane %v683_v18, %v1561_v12 }
 0x2f1   :  { %v698_v23 = vadd.f32 %v696_v22, %v690_v19  ;;  %v699_v24 = vadd.f32 %v696_v22, %v691_v20 }
 0x2f3   :  { %v700_v25 = vmul.f32 0.2, %v698_v23  ;;  %v701_v26 = vmul.f32 0.2, %v699_v24 }
 0x2f5   :  { %v703_v29 = vmax.f32 %v699_v24, %v701_v26  ;;  %v702_v31 = vmax.f32 %v698_v23, %v700_v25  ;;  %v903_v24 = vld [vmem:[#allocation16] sm:$0x1] }
 0x2f7   :  { %v704_v21 = vpack.c.bf16 %v703_v29, %v702_v31 }
 0x2f9   :  { %v706_v33 = vshrl.u32 %v704_v21, 16  ;;  %v710_v34 = vshll.u32 %v704_v21, 16  ;;  %1024 = vmatmul.mubr.msk.bf16.vlgmr.msra.gmra.mxu0 %vm651_vm10, %v704_v21 }
 0x2fa   :  { %1034 = vmatpush3.bf16.msra.mxu0 %v823_v32  ;;  %1035 = vmatprep.mubr.msk.bf16.mxu0 %vm1315_vm0, %v1314_v1 }
 0x2fb   :  { %v708_v35 = vrot.slane %v706_v33, 7  ;;  %v716_v36 = vrot.slane %v710_v34, 1 }
 0x2fd   :  { %v712_v37 = vor.u32 %v710_v34, %v708_v35  ;;  %v717_v38 = vor.u32 %v716_v36, %v706_v33 }
 0x2ff   :  { %v714_v41 = vsel %vm1503_vm7, %v708_v35, %v712_v37  ;;  %v720_v42 = vsel %vm1498_vm6, %v717_v38, %v716_v36 }
 0x300   :  { %v715_v43 = vmul.bf16 %v1513_v40, %v714_v41  ;;  %v721_v44 = vmul.bf16 %v1511_v39, %v720_v42 }
 0x302   :  { %1030 = vmatmul.mubr.msk.bf16.vlgmr.msra.gmra.mxu1 %vm651_vm10, %v715_v43  ;;  %1036 = vmatmul.mubr.msk.bf16.vlgmr.msra.gmra.mxu0 %vm651_vm10, %v721_v44 }
 0x3b9   :  { %v764_v45 = vpop.f32.mrf.mxu0 }
 0x3bb   :  { %v1025_v1 = vpop.f32.mrf.mxu0 }
 0x3bd   :  { %v767_v46 = vpop.f32.mrf.mxu0 }
 0x3bf   :  { %v1026_v47 = vpop.f32.mrf.mxu0 }
 0x3c2   :  { %v811_v48 = vpop.f32.mrf.mxu1  ;;  %v859_v49 = vpop.f32.mrf.mxu0 }
 0x3c3   :  { %v812_v50 = vadd.f32 %v811_v48, %v764_v45 }
 0x3c4   :  { %v1031_v51 = vpop.f32.mrf.mxu1  ;;  %v1037_v52 = vpop.f32.mrf.mxu0 }
 0x3c5   :  { %v866_v28 = vadd.f32 %v859_v49, %v812_v50 }
 0x3c6   :  { %v814_v53 = vpop.f32.mrf.mxu1  ;;  %v862_v54 = vpop.f32.mrf.mxu0 }
 0x3c7   :  { %v875_v40 = vadd.f32 %v957_v30, %v866_v28  ;;  %v815_v55 = vadd.f32 %v814_v53, %v767_v46 }
 0x3c8   :  { %v1032_v39 = vpop.f32.mrf.mxu1  ;;  %v1038_v56 = vpop.f32.mrf.mxu0 }
 0x3c9   :  { %v867_v57 = vadd.f32 %v862_v54, %v815_v55  ;;  %v888_v58 = vmul.f32 %v875_v40, %v875_v40  ;;  %v878_v60 = vsel %vm877_vm11, %v875_v40, 0.0 }
 0x3cb   :  { %v876_v59 = vadd.f32 %v957_v30, %v867_v57  ;;  %v890_v0 = vsel %vm877_vm11, %v888_v58, 0.0 }
 0x3cd   :  { %v879_v61 = vsel %vm877_vm11, %v876_v59, 0.0  ;;  %v889_v62 = vmul.f32 %v876_v59, %v876_v59 }
 0x3ce   :  { %v880_v63 = vadd.f32 %v879_v61, %v878_v60 }
 0x3cf   :  { %v891_v2 = vsel %vm877_vm11, %v889_v62, 0.0 }
 0x3d0   :  { %v881_v3 = vrot.slane %v880_v63, 4  ;;  %v892_v4 = vadd.f32 %v891_v2, %v890_v0 }
 0x3d2   :  { %v882_v5 = vadd.f32 %v881_v3, %v880_v63  ;;  %v893_v6 = vrot.slane %v892_v4, 4 }
 0x3d4   :  { %v883_v7 = vrot.slane %v882_v5, 2  ;;  %v894_v8 = vadd.f32 %v893_v6, %v892_v4 }
 0x3d6   :  { %v884_v9 = vadd.f32 %v883_v7, %v882_v5  ;;  %v895_v10 = vrot.slane %v894_v8, 2 }
 0x3d8   :  { %v885_v11 = vrot.slane %v884_v9, 1  ;;  %v896_v13 = vadd.f32 %v895_v10, %v894_v8 }
 0x3da   :  { %v886_v14 = vadd.f32 %v885_v11, %v884_v9  ;;  %v897_v15 = vrot.slane %v896_v13, 1 }
 0x3dc   :  { %v887_v16 = vmul.f32 0.0625, %v886_v14  ;;  %v898_v17 = vadd.f32 %v897_v15, %v896_v13 }
 0x3de   :  { %v899_v18 = vmul.f32 0.0625, %v898_v17  ;;  %v900_v19 = vmul.f32 %v887_v16, %v887_v16 }
 0x3e0   :  { %v901_v20 = vsub.f32 %v899_v18, %v900_v19 }
 0x3e2   :  { %v902_v22 = vmax.f32 %v901_v20, 0.0 }
 0x3e4   :  { %v904_v23 = vadd.f32 1e-05, %v902_v22 }
 0x3e6   :  { %1066 = vrsqrt.f32 %v904_v23 }
 0x3f3   :  { %v1067_v25 = vpop.eup %1066 }
 0x3f4   :  { %v906_v26 = vmul.f32 %v1067_v25, %v903_v24 }
 0x3f6   :  { %v908_v29 = vmul.f32 %v906_v26, %v887_v16  ;;  %v914_v31 = vrot.slane %v906_v26, %v1561_v12 }
 0x3f8   :  { %v909_v21 = vsub.f32 %v907_v27, %v908_v29  ;;  %v916_v32 = vmul.f32 %v914_v31, %v875_v40  ;;  %v917_v33 = vmul.f32 %v914_v31, %v876_v59 }
 0x3fa   :  { %v922_v34 = vrot.slane %v909_v21, %v1561_v12 }
 0x3fc   :  { %v924_v35 = vadd.f32 %v922_v34, %v916_v32  ;;  %v925_v36 = vadd.f32 %v922_v34, %v917_v33 }
 0x3fe   :  { %926 = vst.msk [vmem:[%s1610_s19] sm:$0xff] %vm877_vm11, %v924_v35  ;;  %927 = vst.msk [vmem:[%s1610_s19 + $0x8] sm:$0xff] %vm877_vm11, %v925_v36 }
 0x3ff   :  { %932 = vsyncpa [#allocation3], 1 }
 0x400   :  { %933 = vsyncpa [#allocation5], 1 }
 0x401   :  { %934 = vsyncpa [#allocation8], 1 }
 0x402   :  { %935 = vsyncpa [#allocation11], 1 }
 0x403   :  { %936 = vsyncpa [#allocation14], 1 }
 0x404   :  { %937 = vsyncpa [#allocation17], 1 }

// kernel: generator_forward.3
= control target key start
LH: loop header
LB: loop body
LE: loop exit
PB: predicated region body
PF: predicated region fallthrough
CT: control target
= control target key end

     0   :  { %17 = vsyncpa [#allocation3], 0  ;;  %s1679_s21 = smov [#allocation2]   ;;  %s2084_s0 = inlined_call_operand.vmem [shape: f32[2,128], index: 0, kind: input, shape index: {}]   ;;  %s2085_s1 = inlined_call_operand.vmem [shape: f32[2,16], index: 1, kind: input, shape index: {}]   ;;  %s2086_s2 = inlined_call_operand.vmem [shape: f32[2,32], index: 2, kind: input, shape index: {}]   ;;  %s2087_s3 = inlined_call_operand.hbm [shape: bf16[128,512], index: 3, kind: input, shape index: {}]   ;;  %s2088_s4 = inlined_call_operand.vmem [shape: bf16[16,512], index: 4, kind: input, shape index: {}]   ;;  %s2089_s5 = inlined_call_operand.vmem [shape: f32[1,512], index: 5, kind: input, shape index: {}]   ;;  %s2090_s6 = inlined_call_operand.vmem [shape: bf16[512,256], index: 6, kind: input, shape index: {}]   ;;  %s2091_s7 = inlined_call_operand.vmem [shape: f32[1,256], index: 7, kind: input, shape index: {}]   ;;  %s2092_s8 = inlined_call_operand.vmem [shape: bf16[256,64], index: 8, kind: input, shape index: {}]   ;;  %s2093_s9 = inlined_call_operand.vmem [shape: f32[1,64], index: 9, kind: input, shape index: {}]   ;;  %s2094_s10 = inlined_call_operand.vmem [shape: bf16[64,32], index: 10, kind: input, shape index: {}]   ;;  %s2095_s11 = inlined_call_operand.vmem [shape: f32[1,32], index: 11, kind: input, shape index: {}]   ;;  %s2096_s12 = inlined_call_operand.vmem [shape: bf16[2,32], index: 12, kind: output, shape index: {}]  }
   0x1   :  { %s29_s22 = sshll.u32 %s1679_s21, 4  ;;  %s30_s22 = int_to_ptr.vmem [resolvable:$true] %s29_s22 }
   0x2   :  { %s1665_s23 = scalar_lea.vmem %s30_s22, 4096  ;;  %p1670_p1 = scmp.lt.s32.totalorder %s30_s22, %s30_s22 }
   0x3   :  { %p1666_p0 = scmp.ne.s32.totalorder %s30_s22, %s1665_s23  ;;  %p1671_p2 = scmp.lt.s32.totalorder %s1665_s23, %s1665_s23 }
   0x5   :  { %p1672_p3 = por %p1671_p2, %p1670_p1 }
   0x7   :  { %p1673_p4 = pnand %p1672_p3, %p1666_p0 }
   0x9   :  { %1676 = shalt.err (!%p1673_p4)
}
   0xa   :  { %s1680_s24 = smov 256   ;;  %s1681_s25 = smov 16  }
   0xb   :  { %35 = dma.hbm_to_vmem [thread:$0]  %s2087_s3, 4096, %s30_s22, [#allocation3], %s1680_s24, %s1680_s24, %s1681_s25  }
   0xc   :  { %1677 = dma.done.wait [#allocation3], 4096  }
   0xd   :  { %1678 = vsyncadd [#allocation3], 4294963200  ;;  %v1682_v0 = vmov 0   ;;  %v1487_v1 = vld [vmem:[%s2088_s4 + $0x4] ss:$16 sps:$4 sm:$0xff]   ;;  %vm116_vm0 = vcmask 130048  }
   0xe   :  { %152 = vmatprep.mubr.bf16.mxu1 %v1682_v0  ;;  %394 = vmatprep.mubr.bf16.mxu0 %v1682_v0  ;;  %v1489_v2 = vld [vmem:[#allocation2 + $0xe4] ss:$16 sps:$4 sm:$0xff]   ;;  %v1491_v3 = vld [vmem:[%s2088_s4] ss:$16 sps:$4 sm:$0xff]   ;;  %v1493_v7 = vld [vmem:[%s2088_s4 + $0x8] ss:$16 sps:$4 sm:$0xff]  }
   0xf   :  { %134 = vmatprep.subr.bf16.mxu1 %v1487_v1  ;;  %v1492_v4 = vld [vmem:[#allocation2 + $0xe0] ss:$16 sps:$4 sm:$0xff]   ;;  %362 = vmatprep.subr.bf16.mxu0 %v1489_v2  ;;  %v1495_v8 = vld [vmem:[%s2088_s4 + $0xc] ss:$16 sps:$4 sm:$0xff]   ;;  %v1496_v9 = vld [vmem:[#allocation2 + $0xc4] ss:$16 sps:$4 sm:$0xff]  }
  0x10   :  { %v90_v5 = vld [vmem:[%s2085_s1] sm:$0x3]  ;;  %135 = vmatpush1.bf16.msra.mxu1 %v1491_v3  ;;  %363 = vmatpush1.bf16.msra.mxu0 %v1492_v4  ;;  %v1499_v11 = vld [vmem:[#allocation2 + $0xa4] ss:$16 sps:$4 sm:$0xff]   ;;  %v1504_v13 = vld [vmem:[#allocation2 + $0xec] ss:$16 sps:$4 sm:$0xff]  }
  0x11   :  { %v91_v6 = vpack.c.bf16 %v90_v5, %v90_v5  ;;  %v1498_v10 = vld [vmem:[#allocation2 + $0xc0] ss:$16 sps:$4 sm:$0xff]   ;;  %175 = vmatprep.subr.bf16.mxu1 %v1495_v8  ;;  %364 = vmatprep.subr.bf16.mxu0 %v1496_v9  ;;  %v1505_v14 = vld [vmem:[#allocation2 + $0x84] ss:$16 sps:$4 sm:$0xff]   ;;  %v1502_v15 = vld [vmem:[#allocation2 + $0xe8] ss:$16 sps:$4 sm:$0xff]  }
  0x12   :  { %v1501_v12 = vld [vmem:[#allocation2 + $0xa0] ss:$16 sps:$4 sm:$0xff]   ;;  %v1510_v17 = vld [vmem:[#allocation2 + $0xcc] ss:$16 sps:$4 sm:$0xff]   ;;  %v1511_v18 = vld [vmem:[#allocation2 + $0x64] ss:$16 sps:$4 sm:$0xff]  }
  0x13   :  { %1312 = vmatmul.mubr.msk.bf16.vlgmr.msra.gmra.mxu1 %vm116_vm0, %v91_v6  ;;  %v1507_v16 = vld [vmem:[#allocation2 + $0x80] ss:$16 sps:$4 sm:$0xff]   ;;  %v1508_v19 = vld [vmem:[#allocation2 + $0xc8] ss:$16 sps:$4 sm:$0xff]   ;;  %v1516_v21 = vld [vmem:[#allocation2 + $0xac] ss:$16 sps:$4 sm:$0xff]  }
  0x14   :  { %176 = vmatpush1.bf16.msra.mxu1 %v1493_v7  ;;  %365 = vmatpush1.bf16.msra.mxu0 %v1498_v10  ;;  %v1513_v20 = vld [vmem:[#allocation2 + $0x60] ss:$16 sps:$4 sm:$0xff]   ;;  %v1517_v22 = vld [vmem:[#allocation2 + $0x44] ss:$16 sps:$4 sm:$0xff]   ;;  %v1514_v23 = vld [vmem:[#allocation2 + $0xa8] ss:$16 sps:$4 sm:$0xff]  }
  0x15   :  { %366 = vmatprep.subr.bf16.mxu0 %v1499_v11  ;;  %193 = vmatprep.mubr.bf16.mxu1 %v1682_v0  ;;  %v1519_v24 = vld [vmem:[#allocation2 + $0x40] ss:$16 sps:$4 sm:$0xff]   ;;  %v1522_v25 = vld [vmem:[#allocation2 + $0x8c] ss:$16 sps:$4 sm:$0xff]   ;;  %v1523_v26 = vld [vmem:[#allocation2 + $0x24] ss:$16 sps:$4 sm:$0xff]  }
  0x16   :  { %403 = vmatprep.subr.bf16.mxu1 %v1504_v13  ;;  %v1520_v27 = vld [vmem:[#allocation2 + $0x88] ss:$16 sps:$4 sm:$0xff]   ;;  %v1525_v28 = vld [vmem:[#allocation2 + $0x20] ss:$16 sps:$4 sm:$0xff]   ;;  %v1528_v29 = vld [vmem:[#allocation2 + $0x6c] ss:$16 sps:$4 sm:$0xff]  }
  0x17   :  { %v1529_v30 = vld [vmem:[#allocation2 + $0x4] ss:$16 sps:$4 sm:$0xff]   ;;  %v1526_v31 = vld [vmem:[#allocation2 + $0x68] ss:$16 sps:$4 sm:$0xff]   ;;  %v1531_v32 = vld [vmem:[#allocation2] ss:$16 sps:$4 sm:$0xff]  }
  0x18   :  { %367 = vmatpush1.bf16.msra.mxu0 %v1501_v12  ;;  %v56_v33 = vld [vmem:[%s2084_s0] sm:$0x3]  ;;  %v1534_v34 = vld [vmem:[#allocation2 + $0x4c] ss:$16 sps:$4 sm:$0xff]   ;;  %v1532_v37 = vld [vmem:[#allocation2 + $0x48] ss:$16 sps:$4 sm:$0xff]  }
  0x19   :  { %368 = vmatprep.subr.bf16.mxu0 %v1505_v14  ;;  %v1543_v35 = vld [vmem:[%s2090_s6 + $0x74] ss:$8 sps:$4 sm:$0xff]   ;;  %v57_v36 = vpack.c.bf16 %v56_v33, %v56_v33  ;;  %v1541_v38 = vld [vmem:[%s2090_s6 + $0x70] ss:$8 sps:$4 sm:$0xff]   ;;  %v1546_v40 = vld [vmem:[%s2090_s6 + $0x64] ss:$8 sps:$4 sm:$0xff]  }
  0x1a   :  { %v1537_v39 = vld [vmem:[#allocation2 + $0x2c] ss:$16 sps:$4 sm:$0xff]   ;;  %v1535_v41 = vld [vmem:[#allocation2 + $0x28] ss:$16 sps:$4 sm:$0xff]   ;;  %vm1684_vm1 = vmmov 0   ;;  %vm1183_vm2 = vcmask 523264  }
  0x1b   :  { %1313 = vmatmul.mubr.msk.bf16.vlgmr.msra.gmra.mxu1 %vm116_vm0, %v91_v6  ;;  %v1540_v42 = vld [vmem:[#allocation2 + $0xc] ss:$16 sps:$4 sm:$0xff]   ;;  %v1544_v43 = vld [vmem:[%s2090_s6 + $0x60] ss:$8 sps:$4 sm:$0xff]   ;;  %v1547_v46 = vld [vmem:[%s2090_s6 + $0x50] ss:$8 sps:$4 sm:$0xff]  }
  0x1c   :  { %404 = vmatpush1.bf16.msra.mxu1 %v1502_v15  ;;  %369 = vmatpush1.bf16.msra.mxu0 %v1507_v16  ;;  %v1549_v44 = vld [vmem:[%s2090_s6 + $0x54] ss:$8 sps:$4 sm:$0xff]   ;;  %v1538_v45 = vld [vmem:[#allocation2 + $0x8] ss:$16 sps:$4 sm:$0xff]   ;;  %v1555_v48 = vld [vmem:[%s2090_s6 + $0x44] ss:$8 sps:$4 sm:$0xff]  }
  0x1d   :  { %405 = vmatprep.subr.bf16.mxu1 %v1510_v17  ;;  %370 = vmatprep.subr.bf16.mxu0 %v1511_v18  ;;  %v1552_v47 = vld [vmem:[%s2090_s6 + $0x174] ss:$8 sps:$4 sm:$0xff]   ;;  %v1550_v49 = vld [vmem:[%s2090_s6 + $0x170] ss:$8 sps:$4 sm:$0xff]   ;;  %v1553_v50 = vld [vmem:[%s2090_s6 + $0x40] ss:$8 sps:$4 sm:$0xff]  }
  0x1e   :  { %435 = vmatprep.mubr.bf16.mxu1 %v1682_v0  ;;  %v1558_v51 = vld [vmem:[%s2090_s6 + $0x164] ss:$8 sps:$4 sm:$0xff]   ;;  %v1561_v52 = vld [vmem:[%s2090_s6 + $0x34] ss:$8 sps:$4 sm:$0xff]   ;;  %v1556_v53 = vld [vmem:[%s2090_s6 + $0x160] ss:$8 sps:$4 sm:$0xff]  }
  0x1f   :  { %v1559_v54 = vld [vmem:[%s2090_s6 + $0x30] ss:$8 sps:$4 sm:$0xff]   ;;  %v1564_v55 = vld [vmem:[%s2090_s6 + $0x154] ss:$8 sps:$4 sm:$0xff]   ;;  %v1567_v56 = vld [vmem:[%s2090_s6 + $0x24] ss:$8 sps:$4 sm:$0xff]  }
  0x20   :  { %406 = vmatpush1.bf16.msra.mxu1 %v1508_v19  ;;  %371 = vmatpush1.bf16.msra.mxu0 %v1513_v20  ;;  %v1562_v57 = vld [vmem:[%s2090_s6 + $0x150] ss:$8 sps:$4 sm:$0xff]   ;;  %v1565_v58 = vld [vmem:[%s2090_s6 + $0x20] ss:$8 sps:$4 sm:$0xff]   ;;  %v1570_v60 = vld [vmem:[%s2090_s6 + $0x144] ss:$8 sps:$4 sm:$0xff]  }
  0x21   :  { %407 = vmatprep.subr.bf16.mxu1 %v1516_v21  ;;  %372 = vmatprep.subr.bf16.mxu0 %v1517_v22  ;;  %v1568_v59 = vld [vmem:[%s2090_s6 + $0x140] ss:$8 sps:$4 sm:$0xff]   ;;  %v1573_v61 = vld [vmem:[%s2090_s6 + $0x14] ss:$8 sps:$4 sm:$0xff]   ;;  %v1571_v62 = vld [vmem:[%s2090_s6 + $0x10] ss:$8 sps:$4 sm:$0xff]  }
  0x22   :  { %v1574_v63 = vld [vmem:[%s2090_s6 + $0x130] ss:$8 sps:$4 sm:$0xff]   ;;  %v1576_v1 = vld [vmem:[%s2090_s6 + $0x134] ss:$8 sps:$4 sm:$0xff]   ;;  %v1579_v2 = vld [vmem:[%s2090_s6 + $0x4] ss:$8 sps:$4 sm:$0xff]  }
  0x23   :  { %v1577_v3 = vld [vmem:[%s2090_s6] ss:$8 sps:$4 sm:$0xff]   ;;  %v1582_v5 = vld [vmem:[%s2090_s6 + $0x124] ss:$8 sps:$4 sm:$0xff]   ;;  %v1585_v6 = vld [vmem:[%s2090_s6 + $0xf4] ss:$8 sps:$4 sm:$0xff]  }
  0x24   :  { %408 = vmatpush1.bf16.msra.mxu1 %v1514_v23  ;;  %373 = vmatpush1.bf16.msra.mxu0 %v1519_v24  ;;  %v1580_v4 = vld [vmem:[%s2090_s6 + $0x120] ss:$8 sps:$4 sm:$0xff]   ;;  %v1583_v7 = vld [vmem:[%s2090_s6 + $0xf0] ss:$8 sps:$4 sm:$0xff]   ;;  %v1588_v9 = vld [vmem:[%s2090_s6 + $0x114] ss:$8 sps:$4 sm:$0xff]  }
  0x25   :  { %409 = vmatprep.subr.bf16.mxu1 %v1522_v25  ;;  %374 = vmatprep.subr.bf16.mxu0 %v1523_v26  ;;  %v1586_v8 = vld [vmem:[%s2090_s6 + $0x110] ss:$8 sps:$4 sm:$0xff]   ;;  %v1591_v10 = vld [vmem:[%s2090_s6 + $0xe4] ss:$8 sps:$4 sm:$0xff]   ;;  %v1589_v11 = vld [vmem:[%s2090_s6 + $0xe0] ss:$8 sps:$4 sm:$0xff]  }
  0x26   :  { %v1594_v12 = vld [vmem:[%s2090_s6 + $0x104] ss:$8 sps:$4 sm:$0xff]   ;;  %v1592_v13 = vld [vmem:[%s2090_s6 + $0x100] ss:$8 sps:$4 sm:$0xff]   ;;  %v1597_v14 = vld [vmem:[%s2090_s6 + $0xd4] ss:$8 sps:$4 sm:$0xff]  }
  0x27   :  { %v1595_v15 = vld [vmem:[%s2090_s6 + $0xd0] ss:$8 sps:$4 sm:$0xff]   ;;  %v1600_v16 = vld [vmem:[%s2090_s6 + $0x1f4] ss:$8 sps:$4 sm:$0xff]   ;;  %v1603_v17 = vld [vmem:[%s2090_s6 + $0xc4] ss:$8 sps:$4 sm:$0xff]  }
  0x28   :  { %410 = vmatpush1.bf16.msra.mxu1 %v1520_v27  ;;  %375 = vmatpush1.bf16.msra.mxu0 %v1525_v28  ;;  %v1598_v18 = vld [vmem:[%s2090_s6 + $0x1f0] ss:$8 sps:$4 sm:$0xff]   ;;  %v1601_v19 = vld [vmem:[%s2090_s6 + $0xc0] ss:$8 sps:$4 sm:$0xff]   ;;  %v1606_v20 = vld [vmem:[%s2090_s6 + $0x1e4] ss:$8 sps:$4 sm:$0xff]  }
  0x29   :  { %411 = vmatprep.subr.bf16.mxu1 %v1528_v29  ;;  %376 = vmatprep.subr.bf16.mxu0 %v1529_v30  ;;  %v1609_v21 = vld [vmem:[%s2090_s6 + $0xb4] ss:$8 sps:$4 sm:$0xff]   ;;  %v1604_v22 = vld [vmem:[%s2090_s6 + $0x1e0] ss:$8 sps:$4 sm:$0xff]   ;;  %v1607_v23 = vld [vmem:[%s2090_s6 + $0xb0] ss:$8 sps:$4 sm:$0xff]  }
  0x2a   :  { %v1612_v24 = vld [vmem:[%s2090_s6 + $0x1d4] ss:$8 sps:$4 sm:$0xff]   ;;  %v1610_v25 = vld [vmem:[%s2090_s6 + $0x1d0] ss:$8 sps:$4 sm:$0xff]   ;;  %v1615_v26 = vld [vmem:[%s2090_s6 + $0xa4] ss:$8 sps:$4 sm:$0xff]  }
  0x2b   :  { %v1613_v27 = vld [vmem:[%s2090_s6 + $0xa0] ss:$8 sps:$4 sm:$0xff]   ;;  %v1618_v28 = vld [vmem:[%s2090_s6 + $0x1c4] ss:$8 sps:$4 sm:$0xff]   ;;  %v1621_v30 = vld [vmem:[%s2090_s6 + $0x94] ss:$8 sps:$4 sm:$0xff]  }
  0x2c   :  { %412 = vmatpush1.bf16.msra.mxu1 %v1526_v31  ;;  %377 = vmatpush1.bf16.msra.mxu0 %v1531_v32  ;;  %v1616_v29 = vld [vmem:[%s2090_s6 + $0x1c0] ss:$8 sps:$4 sm:$0xff]   ;;  %v1619_v31 = vld [vmem:[%s2090_s6 + $0x90] ss:$8 sps:$4 sm:$0xff]   ;;  %v1624_v32 = vld [vmem:[%s2090_s6 + $0x1b4] ss:$8 sps:$4 sm:$0xff]  }
  0x2d   :  { %413 = vmatprep.subr.bf16.mxu1 %v1534_v34  ;;  %878 = vmatprep.subr.bf16.mxu0 %v1543_v35  ;;  %v1622_v33 = vld [vmem:[%s2090_s6 + $0x1b0] ss:$8 sps:$4 sm:$0xff]   ;;  %v1625_v34 = vld [vmem:[%s2090_s6 + $0x80] ss:$8 sps:$4 sm:$0xff]   ;;  %v1627_v35 = vld [vmem:[%s2090_s6 + $0x84] ss:$8 sps:$4 sm:$0xff]  }
  0x2e   :  { %s1686_s22 = smov 120   ;;  %vm1295_vm9 = vcmask 64512   ;;  %vm1298_vm15 = vcmask 195584  }
  0x2f   :  { %395 = vmatmul.mubr.bf16.vlgmr.msra.gmra.mxu0 %v57_v36 }
  0x30   :  { %414 = vmatpush1.bf16.msra.mxu1 %v1532_v37  ;;  %879 = vmatpush1.bf16.msra.mxu0 %v1541_v38  ;;  %v1628_v37 = vld [vmem:[%s2090_s6 + $0x1a0] ss:$8 sps:$4 sm:$0xff]   ;;  %v1633_v38 = vld [vmem:[%s2090_s6 + $0x194] ss:$8 sps:$4 sm:$0xff]  }
  0x31   :  { %415 = vmatprep.subr.bf16.mxu1 %v1537_v39  ;;  %880 = vmatprep.subr.bf16.mxu0 %v1546_v40  ;;  %v1631_v39 = vld [vmem:[%s2090_s6 + $0x190] ss:$8 sps:$4 sm:$0xff]   ;;  %v1636_v40 = vld [vmem:[%s2090_s6 + $0x184] ss:$8 sps:$4 sm:$0xff]  }
  0x34   :  { %416 = vmatpush1.bf16.msra.mxu1 %v1535_v41  ;;  %881 = vmatpush1.bf16.msra.mxu0 %v1544_v43  ;;  %v1634_v41 = vld [vmem:[%s2090_s6 + $0x180] ss:$8 sps:$4 sm:$0xff]  }
  0x35   :  { %417 = vmatprep.subr.bf16.mxu1 %v1540_v42  ;;  %882 = vmatprep.subr.bf16.mxu0 %v1549_v44  ;;  %v1637_v42 = vld [vmem:[%s2092_s8 + $0x78] sm:$0xff]  }
  0x38   :  { %418 = vmatpush1.bf16.msra.mxu1 %v1538_v45  ;;  %883 = vmatpush1.bf16.msra.mxu0 %v1547_v46 }
  0x39   :  { %919 = vmatprep.subr.bf16.mxu1 %v1552_v47  ;;  %884 = vmatprep.subr.bf16.mxu0 %v1555_v48 }
  0x3b   :  { %436 = vmatmul.mubr.bf16.vlgmr.msra.gmra.mxu1 %v57_v36  ;;  %v1630_v36 = vld [vmem:[%s2090_s6 + $0x1a4] ss:$8 sps:$4 sm:$0xff]   ;;  %s1687_s6 = smov 112  }
  0x3c   :  { %920 = vmatpush1.bf16.msra.mxu1 %v1550_v49  ;;  %885 = vmatpush1.bf16.msra.mxu0 %v1553_v50 }
  0x3d   :  { %921 = vmatprep.subr.bf16.mxu1 %v1558_v51  ;;  %886 = vmatprep.subr.bf16.mxu0 %v1561_v52  ;;  %v446_v51 = vlaneseq }
  0x3f   :  { %v1978_v52 = vshrl.u32 %v446_v51, 7 }
  0x40   :  { %922 = vmatpush1.bf16.msra.mxu1 %v1556_v53  ;;  %887 = vmatpush1.bf16.msra.mxu0 %v1559_v54  ;;  %v444_v54 = vld [vmem:[%s2089_s5] sm:$0xf] }
  0x41   :  { %923 = vmatprep.subr.bf16.mxu1 %v1564_v55  ;;  %888 = vmatprep.subr.bf16.mxu0 %v1567_v56  ;;  %v448_v53 = vsub.s32 0, %v1978_v52  ;;  %v452_v55 = vsub.s32 1, %v1978_v52 }
  0x43   :  { %v449_v56 = vrot.slane %v444_v54, %v448_v53 }
  0x44   :  { %924 = vmatpush1.bf16.msra.mxu1 %v1562_v57  ;;  %889 = vmatpush1.bf16.msra.mxu0 %v1565_v58 }
  0x45   :  { %925 = vmatprep.subr.bf16.mxu1 %v1570_v60  ;;  %890 = vmatprep.subr.bf16.mxu0 %v1573_v61 }
  0x48   :  { %926 = vmatpush1.bf16.msra.mxu1 %v1568_v59  ;;  %891 = vmatpush1.bf16.msra.mxu0 %v1571_v62  ;;  %v453_v59 = vrot.slane %v444_v54, %v452_v55 }
  0x49   :  { %927 = vmatprep.subr.bf16.mxu1 %v1576_v1  ;;  %892 = vmatprep.subr.bf16.mxu0 %v1579_v2 }
  0x4c   :  { %928 = vmatpush1.bf16.msra.mxu1 %v1574_v63  ;;  %893 = vmatpush1.bf16.msra.mxu0 %v1577_v3 }
  0x4d   :  { %929 = vmatprep.subr.bf16.mxu1 %v1582_v5  ;;  %894 = vmatprep.subr.bf16.mxu0 %v1585_v6  ;;  %v456_v5 = vsub.s32 2, %v1978_v52 }
  0x50   :  { %930 = vmatpush1.bf16.msra.mxu1 %v1580_v4  ;;  %895 = vmatpush2.bf16.msra.mxu0 %v1583_v7  ;;  %v460_v7 = vsub.s32 3, %v1978_v52  ;;  %v1654_v52 = vld [vmem:[%s2094_s10 + $0x10] sm:$0xff]  }
  0x51   :  { %931 = vmatprep.subr.bf16.mxu1 %v1588_v9  ;;  %896 = vmatprep.subr.bf16.mxu0 %v1591_v10  ;;  %v457_v9 = vrot.slane %v444_v54, %v456_v5 }
  0x54   :  { %932 = vmatpush1.bf16.msra.mxu1 %v1586_v8  ;;  %897 = vmatpush2.bf16.msra.mxu0 %v1589_v11  ;;  %v1638_v11 = vld [vmem:[%s2092_s8 + $0x38] sm:$0xff]  }
  0x55   :  { %933 = vmatprep.subr.bf16.mxu1 %v1594_v12  ;;  %898 = vmatprep.subr.bf16.mxu0 %v1597_v14  ;;  %v1639_v14 = vld [vmem:[%s2092_s8 + $0x70] sm:$0xff]  }
  0x58   :  { %934 = vmatpush1.bf16.msra.mxu1 %v1592_v13  ;;  %899 = vmatpush2.bf16.msra.mxu0 %v1595_v15 }
  0x59   :  { %935 = vmatprep.subr.bf16.mxu1 %v1600_v16  ;;  %900 = vmatprep.subr.bf16.mxu0 %v1603_v17  ;;  %v461_v16 = vrot.slane %v444_v54, %v460_v7 }
  0x5c   :  { %936 = vmatpush2.bf16.msra.mxu1 %v1598_v18  ;;  %901 = vmatpush2.bf16.msra.mxu0 %v1601_v19 }
  0x5d   :  { %937 = vmatprep.subr.bf16.mxu1 %v1606_v20  ;;  %902 = vmatprep.subr.bf16.mxu0 %v1609_v21  ;;  %v1640_v20 = vld [vmem:[%s2092_s8 + $0x30] sm:$0xff]  }
  0x60   :  { %938 = vmatpush2.bf16.msra.mxu1 %v1604_v22  ;;  %903 = vmatpush2.bf16.msra.mxu0 %v1607_v23  ;;  %v1641_v22 = vld [vmem:[%s2092_s8 + $0x68] sm:$0xff]  }
  0x61   :  { %939 = vmatprep.subr.bf16.mxu1 %v1612_v24  ;;  %904 = vmatprep.subr.bf16.mxu0 %v1615_v26 }
  0x64   :  { %940 = vmatpush2.bf16.msra.mxu1 %v1610_v25  ;;  %905 = vmatpush2.bf16.msra.mxu0 %v1613_v27 }
  0x65   :  { %941 = vmatprep.subr.bf16.mxu1 %v1618_v28  ;;  %906 = vmatprep.subr.bf16.mxu0 %v1621_v30 }
  0x68   :  { %942 = vmatpush2.bf16.msra.mxu1 %v1616_v29  ;;  %907 = vmatpush2.bf16.msra.mxu0 %v1619_v31  ;;  %v1642_v31 = vld [vmem:[%s2092_s8 + $0x28] sm:$0xff]  }
  0x69   :  { %943 = vmatprep.subr.bf16.mxu1 %v1624_v32  ;;  %908 = vmatprep.subr.bf16.mxu0 %v1627_v35  ;;  %v1643_v32 = vld [vmem:[%s2092_s8 + $0x60] sm:$0xff]   ;;  %v1646_v35 = vld [vmem:[%s2092_s8 + $0x18] sm:$0xff]  }
  0x6c   :  { %944 = vmatpush2.bf16.msra.mxu1 %v1622_v33  ;;  %909 = vmatpush2.bf16.msra.mxu0 %v1625_v34  ;;  %v1644_v33 = vld [vmem:[%s2092_s8 + $0x20] sm:$0xff]   ;;  %v1645_v34 = vld [vmem:[%s2092_s8 + $0x58] sm:$0xff]  }
  0x6d   :  { %945 = vmatprep.subr.bf16.mxu1 %v1630_v36  ;;  %1437 = vmatprep.subr.bf16.mxu0 %v1637_v42  ;;  %v1647_v36 = vld [vmem:[%s2092_s8 + $0x50] sm:$0xff]   ;;  %v1653_v42 = vld [vmem:[%s2094_s10 + $0x18] sm:$0xff]  }
  0x70   :  { %946 = vmatpush2.bf16.msra.mxu1 %v1628_v37  ;;  %v1648_v37 = vld [vmem:[%s2092_s8 + $0x10] sm:$0xff]  }
  0x71   :  { %947 = vmatprep.subr.bf16.mxu1 %v1633_v38  ;;  %v1649_v38 = vld [vmem:[%s2092_s8 + $0x48] sm:$0xff]  }
  0x74   :  { %948 = vmatpush2.bf16.msra.mxu1 %v1631_v39  ;;  %v1650_v39 = vld [vmem:[%s2092_s8 + $0x8] sm:$0xff]  }
  0x75   :  { %949 = vmatprep.subr.bf16.mxu1 %v1636_v40  ;;  %v1651_v40 = vld [vmem:[%s2092_s8 + $0x40] sm:$0xff]  }
  0x78   :  { %950 = vmatpush2.bf16.msra.mxu1 %v1634_v41  ;;  %v1652_v41 = vld [vmem:[%s2092_s8] sm:$0xff]  }
  0xd3   :  { %v154_v43 = vpop.f32.mrf.mxu1 }
  0xd5   :  { %v156_v44 = vpop.f32.mrf.mxu1 }
  0xd7   :  { %v158_v45 = vpop.f32.mrf.mxu1 }
  0xd9   :  { %v159_v46 = vpop.f32.mrf.mxu1 }
  0xda   :  { %v546_v46 = vld [vmem:[%s2091_s7] sm:$0x3] }
  0xdb   :  { %v195_v47 = vpop.f32.mrf.mxu1 }
  0xdd   :  { %v197_v48 = vpop.f32.mrf.mxu1 }
  0xdf   :  { %v199_v49 = vpop.f32.mrf.mxu1 }
  0xe0   :  { %v551_v49 = vrot.slane %v546_v46, %v448_v53  ;;  %v1655_v53 = vld [vmem:[%s2094_s10 + $0x8] sm:$0xff]  }
  0xe1   :  { %v200_v50 = vpop.f32.mrf.mxu1 }
  0xe2   :  { %v555_v50 = vrot.slane %v546_v46, %v452_v55  ;;  %v1656_v55 = vld [vmem:[%s2094_s10] sm:$0xff]  }
  0xef   :  { %v396_v57 = vpop.f32.mrf.mxu0 }
  0xf0   :  { %v397_v58 = vadd.f32 %v396_v57, %v154_v43  ;;  %v1683_v43 = vmov 0.0  }
  0xf1   :  { %v398_v60 = vpop.f32.mrf.mxu0  ;;  %1464 = vmatprep.subr.bf16.mxu1 %v1683_v43 }
  0xf2   :  { %v466_v61 = vadd.f32 %v449_v56, %v397_v58  ;;  %v399_v62 = vadd.f32 %v398_v60, %v156_v44 }
  0xf3   :  { %v400_v63 = vpop.f32.mrf.mxu0 }
  0xf4   :  { %v470_v1 = vmul.f32 0.2, %v466_v61  ;;  %v467_v2 = vadd.f32 %v453_v59, %v399_v62 }
  0xf5   :  { %v401_v3 = vpop.f32.mrf.mxu0 }
  0xf6   :  { %v471_v4 = vmul.f32 0.2, %v467_v2  ;;  %v474_v6 = vmax.f32 %v466_v61, %v470_v1 }
  0xf8   :  { %v475_v8 = vmax.f32 %v467_v2, %v471_v4  ;;  %v478_v12 = vpack.c.bf16 %v474_v6, %v474_v6  ;;  %v1410_v6 = vld [vmem:[%s2093_s9] ss:$0 sm:$0xff]  ;;  %s1685_s9 = smov 104  }
  0xfa   :  { %v479_v10 = vpack.c.bf16 %v475_v8, %v475_v8 }
  0xfb   :  { %v437_v13 = vpop.f32.mrf.mxu1 }
  0xfc   :  { %v438_v15 = vadd.f32 %v437_v13, %v195_v47  ;;  %910 = vmatprep.mubr.bf16.mxu0 %v479_v10 }
  0xfd   :  { %v439_v17 = vpop.f32.mrf.mxu1  ;;  %911 = vmatmul.mubr.bf16.vlgmr.msra.gmra.mxu0 %v478_v12 }
  0xfe   :  { %v468_v18 = vadd.f32 %v457_v9, %v438_v15  ;;  %v440_v19 = vadd.f32 %v439_v17, %v197_v48  ;;  %1438 = vmatpush3.bf16.msra.mxu0 %v1638_v11  ;;  %v1427_v15 = vld [vmem:[%s2095_s11] ss:$0 sm:$0xff]  ;;  %s1688_s11 = smov 8  }
  0xff   :  { %v441_v21 = vpop.f32.mrf.mxu1  ;;  %1439 = vmatprep.subr.bf16.mxu0 %v1639_v14  ;;  %v1227_v17 = vld [vmem:[%s2086_s2] sm:$0x3]  ;;  %s1689_s2 = smov 24  }
 0x100   :  { %v472_v23 = vmul.f32 0.2, %v468_v18  ;;  %v469_v24 = vadd.f32 %v461_v16, %v440_v19 }
 0x101   :  { %v442_v25 = vpop.f32.mrf.mxu1 }
 0x102   :  { %v473_v26 = vmul.f32 0.2, %v469_v24  ;;  %1440 = vmatpush3.bf16.msra.mxu0 %v1640_v20  ;;  %v476_v27 = vmax.f32 %v468_v18, %v472_v23 }
 0x103   :  { %1441 = vmatprep.subr.bf16.mxu0 %v1641_v22 }
 0x104   :  { %v477_v28 = vmax.f32 %v469_v24, %v473_v26  ;;  %v480_v30 = vpack.c.bf16 %v476_v27, %v476_v27 }
 0x106   :  { %v481_v29 = vpack.c.bf16 %v477_v28, %v477_v28  ;;  %1442 = vmatpush3.bf16.msra.mxu0 %v1642_v31 }
 0x107   :  { %1443 = vmatprep.subr.bf16.mxu0 %v1643_v32 }
 0x108   :  { %951 = vmatprep.mubr.bf16.mxu1 %v481_v29 }
 0x109   :  { %952 = vmatmul.mubr.bf16.vlgmr.msra.gmra.mxu1 %v480_v30 }
 0x10a   :  { %1444 = vmatpush3.bf16.msra.mxu0 %v1644_v33  ;;  %1465 = vmatpush3.bf16.msra.mxu1 %v1653_v42 }
 0x10b   :  { %1445 = vmatprep.subr.bf16.mxu0 %v1645_v34  ;;  %1466 = vmatprep.subr.bf16.mxu1 %v1683_v43 }
 0x10c   :  { %1472 = vmatprep.mubr.msk.bf16.mxu1 %vm1684_vm1, %v1683_v43 }
 0x10e   :  { %1446 = vmatpush3.bf16.msra.mxu0 %v1646_v35  ;;  %1467 = vmatpush3.bf16.msra.mxu1 %v1654_v52 }
 0x10f   :  { %1447 = vmatprep.subr.bf16.mxu0 %v1647_v36  ;;  %1468 = vmatprep.subr.bf16.mxu1 %v1683_v43 }
 0x112   :  { %1448 = vmatpush3.bf16.msra.mxu0 %v1648_v37  ;;  %1469 = vmatpush3.bf16.msra.mxu1 %v1655_v53 }
 0x113   :  { %1449 = vmatprep.subr.bf16.mxu0 %v1649_v38  ;;  %1470 = vmatprep.subr.bf16.mxu1 %v1683_v43 }
 0x116   :  { %1450 = vmatpush3.bf16.msra.mxu0 %v1650_v39  ;;  %1471 = vmatpush3.bf16.msra.mxu1 %v1656_v55 }
 0x117   :  { %1451 = vmatprep.subr.bf16.mxu0 %v1651_v40 }
 0x11a   :  { %1452 = vmatpush3.bf16.msra.mxu0 %v1652_v41 }
 0x1bd   :  { %v912_v44 = vpop.f32.mrf.mxu0 }
 0x1be   :  { %v913_v51 = vadd.f32 %v912_v44, %v551_v49 }
 0x1bf   :  { %v914_v45 = vpop.f32.mrf.mxu0 }
 0x1c0   :  { %v915_v56 = vadd.f32 %v914_v45, %v555_v50 }
 0x1c1   :  { %v916_v47 = vpop.f32.mrf.mxu0 }
 0x1c3   :  { %v917_v48 = vpop.f32.mrf.mxu0 }
 0x1c9   :  { %v953_v54 = vpop.f32.mrf.mxu1 }
 0x1ca   :  { %v954_v57 = vadd.f32 %v953_v54, %v913_v51 }
 0x1cb   :  { %v955_v58 = vpop.f32.mrf.mxu1 }
 0x1cc   :  { %v960_v59 = vmul.f32 0.2, %v954_v57  ;;  %v956_v60 = vadd.f32 %v955_v58, %v915_v56 }
 0x1cd   :  { %v957_v61 = vpop.f32.mrf.mxu1 }
 0x1ce   :  { %v961_v62 = vmul.f32 0.2, %v956_v60  ;;  %v962_v63 = vmax.f32 %v954_v57, %v960_v59 }
 0x1cf   :  { %v958_v1 = vpop.f32.mrf.mxu1 }
 0x1d0   :  { %v963_v2 = vmax.f32 %v956_v60, %v961_v62  ;;  %v964_v4 = vpack.c.bf16 %v962_v63, %v962_v63 }
 0x1d2   :  { %v965_v3 = vpack.c.bf16 %v963_v2, %v963_v2 }
 0x1d4   :  { %1133 = vmatprep.mubr.bf16.mxu0 %v965_v3 }
 0x1d5   :  { %1134 = vmatmul.mubr.bf16.vlgmr.msra.gmra.mxu0 %v964_v4 }
 0x295   :  { %v1453_v5 = vpop.f32.mrf.mxu0 }
 0x297   :  { %v1454_v7 = vpop.f32.mrf.mxu0 }
 0x298   :  { %v1455_v8 = vadd.f32 %v1454_v7, %v1453_v5 }
 0x299   :  { %v1456_v9 = vpop.f32.mrf.mxu0 }
 0x29a   :  { %v1136_v10 = vadd.f32 %v1455_v8, %v1410_v6 }
 0x29b   :  { %v1457_v11 = vpop.f32.mrf.mxu0 }
 0x29c   :  { %v1141_v12 = vmul.f32 0.2, %v1136_v10 }
 0x29e   :  { %v1142_v13 = vmax.f32 %v1136_v10, %v1141_v12 }
 0x2a0   :  { %v1143_v14 = vpack.c.bf16 %v1142_v13, %v1142_v13 }
 0x2a2   :  { %1473 = vmatmul.mubr.msk.bf16.vlgmr.msra.gmra.mxu1 %vm1183_vm2, %v1143_v14 }
 0x362   :  { %v1221_v16 = vpop.f32.mrf.mxu1 }
 0x363   :  { %v1222_v18 = vadd.f32 %v1427_v15, %v1221_v16 }
 0x364   :  { %v1474_v19 = vpop.f32.mrf.mxu1 }
 0x365   :  { %v1228_v20 = vadd.f32 %v1227_v17, %v1222_v18 }
 0x366   :  { %v1224_v21 = vpop.f32.mrf.mxu1 }
 0x367   :  { %1238 = vrot.lane.b32.xlu1 %v1228_v20, %s1685_s9  ;;  %1230 = vrot.lane.b32.xlu0 %v1228_v20, %s1686_s22 }
 0x368   :  { %v1475_v22 = vpop.f32.mrf.mxu1 }
 0x36b   :  { %1234 = vrot.lane.b32.xlu0 %v1228_v20, %s1687_s6 }
 0x3d9   :  { %v1231_v23 = vpop.permute.xlu0 %1230  ;;  %v1239_v27 = vpop.permute.xlu1 %1238 }
 0x3da   :  { %v1233_v24 = vmax.f32 %v1228_v20, %v1231_v23 }
 0x3dd   :  { %v1235_v25 = vpop.permute.xlu0 %1234 }
 0x3de   :  { %v1237_v26 = vmax.f32 %v1233_v24, %v1235_v25 }
 0x3e0   :  { %v1241_v28 = vmax.f32 %v1237_v26, %v1239_v27 }
 0x3e2   :  { %1249 = vrot.lane.b32.xlu1 %v1241_v28, %s1688_s11  ;;  %vm1242_vm3 = vcmp.ge.f32.partialorder %v1228_v20, %v1241_v28 }
 0x3e3   :  { %v1433_v29 = vsel %vm1242_vm3, 1.0, %v1683_v43  ;;  %vm1301_vm3 = vcmask 253952  }
 0x3e4   :  { %vm1253_vm4 = vcmp.lt.f32.partialorder %v1433_v29, 0.5 }
 0x3e5   :  { %v1254_v30 = vsel %vm1253_vm4, 1, %v1682_v0 }
 0x3e6   :  { %1255 = vrot.lane.b32.xlu0 %v1254_v30, %s1688_s11 }
 0x3ea   :  { %1266 = vrot.lane.b32.xlu0 %v1241_v28, %s1681_s25 }
 0x454   :  { %v1250_v31 = vpop.permute.xlu1 %1249 }
 0x455   :  { %vm1252_vm5 = vcmp.ge.f32.partialorder %v1228_v20, %v1250_v31 }
 0x458   :  { %v1256_v32 = vpop.permute.xlu0 %1255 }
 0x459   :  { %vm1257_vm6 = vcmp.ne.s32.totalorder %v1256_v32, 0 }
 0x45a   :  { %vm1258_vm7 = vmand %vm1252_vm5, %vm1257_vm6 }
 0x45b   :  { %v1434_v33 = vsel %vm1258_vm7, 1.0, %v1683_v43 }
 0x45c   :  { %1262 = vrot.lane.b32.xlu1 %v1434_v33, %s1686_s22  ;;  %v1267_v37 = vpop.permute.xlu0 %1266  ;;  %v1296_v39 = vsel %vm1295_vm9, %v1433_v29, %v1434_v33 }
 0x45d   :  { %vm1269_vm10 = vcmp.ge.f32.partialorder %v1228_v20, %v1267_v37 }
 0x4ce   :  { %v1263_v34 = vpop.permute.xlu1 %1262 }
 0x4cf   :  { %v1265_v35 = vadd.f32 %v1433_v29, %v1263_v34 }
 0x4d1   :  { %vm1270_vm8 = vcmp.lt.f32.partialorder %v1265_v35, 0.5 }
 0x4d2   :  { %v1271_v36 = vsel %vm1270_vm8, 1, %v1682_v0 }
 0x4d3   :  { %1272 = vrot.lane.b32.xlu1 %v1271_v36, %s1681_s25 }
 0x4d7   :  { %1283 = vrot.lane.b32.xlu1 %v1241_v28, %s1689_s2 }
 0x545   :  { %v1273_v38 = vpop.permute.xlu1 %1272 }
 0x546   :  { %vm1274_vm11 = vcmp.ne.s32.totalorder %v1273_v38, 0 }
 0x547   :  { %vm1275_vm12 = vmand %vm1269_vm10, %vm1274_vm11 }
 0x548   :  { %v1435_v40 = vsel %vm1275_vm12, 1.0, %v1683_v43 }
 0x549   :  { %1279 = vrot.lane.b32.xlu0 %v1435_v40, %s1687_s6  ;;  %v1297_v41 = vsel %vm116_vm0, %v1296_v39, %v1435_v40  ;;  %v1284_v46 = vpop.permute.xlu1 %1283 }
 0x54a   :  { %vm1286_vm14 = vcmp.ge.f32.partialorder %v1228_v20, %v1284_v46 }
 0x5bb   :  { %v1280_v42 = vpop.permute.xlu0 %1279 }
 0x5bc   :  { %v1282_v44 = vadd.f32 %v1280_v42, %v1265_v35 }
 0x5be   :  { %vm1287_vm13 = vcmp.lt.f32.partialorder %v1282_v44, 0.5 }
 0x5bf   :  { %v1288_v45 = vsel %vm1287_vm13, 1, %v1682_v0 }
 0x5c0   :  { %1289 = vrot.lane.b32.xlu0 %v1288_v45, %s1689_s2 }
 0x632   :  { %v1290_v47 = vpop.permute.xlu0 %1289 }
 0x633   :  { %vm1291_vm1 = vcmp.ne.s32.totalorder %v1290_v47, 0 }
 0x634   :  { %vm1292_vm2 = vmand %vm1286_vm14, %vm1291_vm1 }
 0x635   :  { %v1436_v48 = vsel %vm1292_vm2, 1.0, %v1683_v43 }
 0x636   :  { %v1299_v49 = vsel %vm1298_vm15, %v1297_v41, %v1436_v48 }
 0x637   :  { %v1300_v50 = vpack.c.bf16 %v1299_v49, %v1299_v49 }
 0x639   :  { %1302 = vst.msk [vmem:[%s2096_s12] sm:$0x1] %vm1301_vm3, %v1300_v50 }
 0x63a   :  { %1307 = vsyncpa [#allocation3], 1 }

</bundles_post_ra>
